<compile_context>
chip_gen: v5e
topology: v5e:2x2
jax: 0.10.0
libtpu: 0.0.40
codegen_flags: <defaults>
</compile_context>

<pallas_src>
import functools

import jax
import jax.numpy as jnp
from jax.experimental import pallas as pl
from jax.experimental.pallas import tpu as pltpu


# ---------------------------------------------------------------------------
# In-kernel LSTM cell math (shared by encoder / decoder kernels)
# ---------------------------------------------------------------------------
def _lstm_cell(x, h, c, wih_ref, whh_ref, b_ref):
    """One LSTM cell step. Gate order matches PyTorch: i, f, g, o."""
    H = h.shape[1]
    gates = (jnp.dot(x, wih_ref[...], preferred_element_type=jnp.float32)
             + jnp.dot(h, whh_ref[...], preferred_element_type=jnp.float32)
             + b_ref[...])
    # H is a multiple of 128 -> each slice is a whole lane-aligned block (no XLU shuffles).
    i = jax.nn.sigmoid(gates[:, 0:H])
    f = jax.nn.sigmoid(gates[:, H:2 * H])
    g = jnp.tanh(gates[:, 2 * H:3 * H])
    o = jax.nn.sigmoid(gates[:, 3 * H:4 * H])
    c_new = f * c + i * g
    h_new = o * jnp.tanh(c_new)
    return h_new, c_new


# ---------------------------------------------------------------------------
# Fused encoder kernel: grid=(src_len,), h/c live in resident output blocks
# ---------------------------------------------------------------------------
def _encoder_kernel(x_ref, wih_ref, whh_ref, b_ref, h_ref, c_ref):
    @pl.when(pl.program_id(0) == 0)
    def _():
        h_ref[...] = jnp.zeros_like(h_ref)
        c_ref[...] = jnp.zeros_like(c_ref)

    h_new, c_new = _lstm_cell(x_ref[0], h_ref[...], c_ref[...],
                              wih_ref, whh_ref, b_ref)
    h_ref[...] = h_new
    c_ref[...] = c_new


def encoder_forward(x_emb, wih, whh, b):
    """x_emb: (T, B, E) pre-embedded source. Returns final (h, c), each (B, H)."""
    T, B, E = x_emb.shape
    H = whh.shape[0]
    return pl.pallas_call(
        _encoder_kernel,
        grid=(T,),
        in_specs=[
            pl.BlockSpec((1, B, E), lambda t: (t, 0, 0)),      # streamed per step
            pl.BlockSpec((E, 4 * H), lambda t: (0, 0)),        # resident weights
            pl.BlockSpec((H, 4 * H), lambda t: (0, 0)),
            pl.BlockSpec((1, 4 * H), lambda t: (0, 0)),
        ],
        out_specs=(
            pl.BlockSpec((B, H), lambda t: (0, 0)),            # resident carry (h)
            pl.BlockSpec((B, H), lambda t: (0, 0)),            # resident carry (c)
        ),
        out_shape=(jax.ShapeDtypeStruct((B, H), jnp.float32),
                   jax.ShapeDtypeStruct((B, H), jnp.float32)),
        compiler_params=pltpu.CompilerParams(
            dimension_semantics=("arbitrary",)),               # sequential recurrence
    )(x_emb, wih, whh, b)


# ---------------------------------------------------------------------------
# Fused decoder kernel: grid=(tgt_len-1,), h/c in VMEM scratch, fused vocab proj
# ---------------------------------------------------------------------------
def _decoder_kernel(x_ref, h0_ref, c0_ref, wih_ref, whh_ref, b_ref,
                    fcw_ref, fcb_ref, logits_ref, h_sc, c_sc):
    @pl.when(pl.program_id(0) == 0)
    def _():
        h_sc[...] = h0_ref[...]
        c_sc[...] = c0_ref[...]

    h_new, c_new = _lstm_cell(x_ref[0], h_sc[...], c_sc[...],
                              wih_ref, whh_ref, b_ref)
    h_sc[...] = h_new
    c_sc[...] = c_new
    logits_ref[0] = (jnp.dot(h_new, fcw_ref[...],
                             preferred_element_type=jnp.float32)
                     + fcb_ref[...])


def decoder_forward(x_emb, h0, c0, wih, whh, b, fcw, fcb):
    """x_emb: (T, B, E) pre-embedded decoder inputs. Returns logits (T, B, V)."""
    T, B, E = x_emb.shape
    H = whh.shape[0]
    V = fcw.shape[1]
    return pl.pallas_call(
        _decoder_kernel,
        grid=(T,),
        in_specs=[
            pl.BlockSpec((1, B, E), lambda t: (t, 0, 0)),      # streamed per step
            pl.BlockSpec((B, H), lambda t: (0, 0)),            # encoder h (read at t==0)
            pl.BlockSpec((B, H), lambda t: (0, 0)),            # encoder c (read at t==0)
            pl.BlockSpec((E, 4 * H), lambda t: (0, 0)),        # resident weights
            pl.BlockSpec((H, 4 * H), lambda t: (0, 0)),
            pl.BlockSpec((1, 4 * H), lambda t: (0, 0)),
            pl.BlockSpec((H, V), lambda t: (0, 0)),
            pl.BlockSpec((1, V), lambda t: (0, 0)),
        ],
        out_specs=pl.BlockSpec((1, B, V), lambda t: (t, 0, 0)),  # lane-dense logits tile
        out_shape=jax.ShapeDtypeStruct((T, B, V), jnp.float32),
        scratch_shapes=[pltpu.VMEM((B, H), jnp.float32),         # h carry
                        pltpu.VMEM((B, H), jnp.float32)],        # c carry
        compiler_params=pltpu.CompilerParams(
            dimension_semantics=("arbitrary",)),
    )(x_emb, h0, c0, wih, whh, b, fcw, fcb)


# ---------------------------------------------------------------------------
# Parameters (deterministic synthetic init, mirrors Encoder/Decoder __init__)
# ---------------------------------------------------------------------------
def init_params(key, src_vocab, tgt_vocab, emb, hid):
    ks = jax.random.split(key, 10)
    s = 0.1
    p = dict(
        enc_emb=jax.random.normal(ks[0], (src_vocab, emb)) * s,
        enc_wih=jax.random.normal(ks[1], (emb, 4 * hid)) * s,
        enc_whh=jax.random.normal(ks[2], (hid, 4 * hid)) * s,
        enc_b=jax.random.normal(ks[3], (1, 4 * hid)) * s,          # b_ih + b_hh combined
        dec_emb=jax.random.normal(ks[4], (tgt_vocab, emb)) * s,
        dec_wih=jax.random.normal(ks[5], (emb, 4 * hid)) * s,
        dec_whh=jax.random.normal(ks[6], (hid, 4 * hid)) * s,
        dec_b=jax.random.normal(ks[7], (1, 4 * hid)) * s,
        fc_w=jax.random.normal(ks[8], (hid, tgt_vocab)) * s,
        fc_b=jax.random.normal(ks[9], (1, tgt_vocab)) * s,
    )
    return jax.tree_util.tree_map(lambda a: a.astype(jnp.float32), p)


# ---------------------------------------------------------------------------
# Seq2Seq forward
# ---------------------------------------------------------------------------
def seq2seq_forward(params, source, target, teacher_force_ratio=1.0):
    """source: (src_len, batch) int32, target: (tgt_len, batch) int32
    returns: (tgt_len, batch, tgt_vocab) float32; outputs[0] == 0 (as in PyTorch)."""
    src_len, B = source.shape
    tgt_len = target.shape[0]
    V = params["fc_w"].shape[1]

    # ----- encoder: embed the whole source once, one fused kernel over time -----
    src_emb = jnp.take(params["enc_emb"], source, axis=0)            # (src_len, B, E)
    h, c = encoder_forward(src_emb, params["enc_wih"], params["enc_whh"],
                           params["enc_b"])

    # ----- decoder: with full teacher forcing the inputs are target[:-1]; embed once,
    #       then one fused kernel over the tgt_len-1 steps (LSTM cell + vocab proj).
    # TODO(synk): teacher_force_ratio < 1.0 (per-step random.random() feedback of argmax
    # as in the PyTorch loop) would need an in-kernel argmax + embedding gather; only the
    # fully teacher-forced path is fused here.
    dec_in_emb = jnp.take(params["dec_emb"], target[:-1], axis=0)    # (tgt_len-1, B, E)
    logits = decoder_forward(dec_in_emb, h, c,
                             params["dec_wih"], params["dec_whh"], params["dec_b"],
                             params["fc_w"], params["fc_b"])         # (tgt_len-1, B, V)

    return jnp.concatenate([jnp.zeros((1, B, V), jnp.float32), logits], axis=0)


# ---------------------------------------------------------------------------
# Pure-JAX reference (mirrors the PyTorch loop literally, full teacher forcing)
# ---------------------------------------------------------------------------
def _reference_forward(params, source, target):
    H = params["enc_whh"].shape[0]
    B = source.shape[1]
    V = params["fc_w"].shape[1]

    def cell(x, h, c, wih, whh, b):
        gates = x @ wih + h @ whh + b
        i = jax.nn.sigmoid(gates[:, 0:H])
        f = jax.nn.sigmoid(gates[:, H:2 * H])
        g = jnp.tanh(gates[:, 2 * H:3 * H])
        o = jax.nn.sigmoid(gates[:, 3 * H:4 * H])
        c = f * c + i * g
        return o * jnp.tanh(c), c

    src_emb = jnp.take(params["enc_emb"], source, axis=0)
    h = jnp.zeros((B, H), jnp.float32)
    c = jnp.zeros((B, H), jnp.float32)
    for t in range(source.shape[0]):
        h, c = cell(src_emb[t], h, c, params["enc_wih"], params["enc_whh"],
                    params["enc_b"])

    outs = [jnp.zeros((B, V), jnp.float32)]
    x = target[0]
    for t in range(1, target.shape[0]):
        x_emb = jnp.take(params["dec_emb"], x, axis=0)
        h, c = cell(x_emb, h, c, params["dec_wih"], params["dec_whh"],
                    params["dec_b"])
        outs.append(h @ params["fc_w"] + params["fc_b"])
        x = target[t]                                        # teacher forcing
    return jnp.stack(outs, axis=0)


# ---------------------------------------------------------------------------
if __name__ == "__main__":
    # Lane-aligned sizes: H and TGT_VOCAB are multiples of 128 so gate slices and the
    # logits / h / c stores are lane-dense (no masked vst, no cross-lane extracts).
    SRC_VOCAB, TGT_VOCAB = 64, 128
    EMB, HID = 128, 128
    SRC_LEN, TGT_LEN, BATCH = 7, 6, 8

    key = jax.random.PRNGKey(0)
    kp, ks, kt = jax.random.split(key, 3)

    params = init_params(kp, SRC_VOCAB, TGT_VOCAB, EMB, HID)
    source = jax.random.randint(ks, (SRC_LEN, BATCH), 0, SRC_VOCAB, dtype=jnp.int32)
    target = jax.random.randint(kt, (TGT_LEN, BATCH), 0, TGT_VOCAB, dtype=jnp.int32)

    fwd = jax.jit(functools.partial(seq2seq_forward, teacher_force_ratio=1.0))
    outputs = fwd(params, source, target)
    jax.block_until_ready(outputs)

    assert outputs.shape == (TGT_LEN, BATCH, TGT_VOCAB)
    assert outputs.dtype == jnp.float32

    ref = _reference_forward(params, source, target)
    max_err = float(jnp.max(jnp.abs(outputs - ref)))
    assert max_err < 2e-2, f"mismatch vs reference: max abs err = {max_err}"
    print("KERNEL_OK")
</pallas_src>

<mosaic_0001>
module attributes {stable_mosaic.version = 11 : i64} {
  func.func @_encoder_kernel(%arg0: i32, %arg1: memref<1x8x128xf32, #tpu.memory_space<vmem>>, %arg2: memref<128x512xf32, #tpu.memory_space<vmem>>, %arg3: memref<128x512xf32, #tpu.memory_space<vmem>>, %arg4: memref<1x512xf32, #tpu.memory_space<vmem>>, %arg5: memref<8x128xf32, #tpu.memory_space<vmem>>, %arg6: memref<8x128xf32, #tpu.memory_space<vmem>>) attributes {dimension_semantics = [#tpu.dimension_semantics<arbitrary>], iteration_bounds = array<i64: 7>, scalar_prefetch = 0 : i64, scratch_operands = 0 : i64, tpu.core_type = #tpu.core_type<tc>, window_params = [{transform_indices = @transform_0, window_bounds = array<i64: 1, 8, 128>}, {pipeline_mode = #tpu.pipeline_mode<synchronous>, transform_indices = @transform_1, window_bounds = array<i64: 128, 512>}, {pipeline_mode = #tpu.pipeline_mode<synchronous>, transform_indices = @transform_2, window_bounds = array<i64: 128, 512>}, {pipeline_mode = #tpu.pipeline_mode<synchronous>, transform_indices = @transform_3, window_bounds = array<i64: 1, 512>}, {pipeline_mode = #tpu.pipeline_mode<synchronous>, transform_indices = @transform_4, window_bounds = array<i64: 8, 128>}, {pipeline_mode = #tpu.pipeline_mode<synchronous>, transform_indices = @transform_5, window_bounds = array<i64: 8, 128>}]} {
    %c0_i32 = arith.constant 0 : i32
    %0 = arith.cmpi eq, %arg0, %c0_i32 : i32
    %1 = arith.extui %0 : i1 to i32
    %c0_i32_0 = arith.constant 0 : i32
    %2 = arith.cmpi ne, %1, %c0_i32_0 : i32
    scf.if %2 {
      %cst_21 = arith.constant 0.000000e+00 : f32
      %42 = vector.broadcast %cst_21 : f32 to vector<8x128xf32>
      %c0_22 = arith.constant 0 : index
      %c0_23 = arith.constant 0 : index
      %43 = vector.load %arg5[%c0_22, %c0_23] : memref<8x128xf32, #tpu.memory_space<vmem>>, vector<8x128xf32>
      tpu.vector_store %arg5[%c0_22, %c0_23], %42 {strides = array<i32>} : memref<8x128xf32, #tpu.memory_space<vmem>>, vector<8x128xf32>,
      %cst_24 = arith.constant 0.000000e+00 : f32
      %44 = vector.broadcast %cst_24 : f32 to vector<8x128xf32>
      %c0_25 = arith.constant 0 : index
      %c0_26 = arith.constant 0 : index
      %45 = vector.load %arg6[%c0_25, %c0_26] : memref<8x128xf32, #tpu.memory_space<vmem>>, vector<8x128xf32>
      tpu.vector_store %arg6[%c0_25, %c0_26], %44 {strides = array<i32>} : memref<8x128xf32, #tpu.memory_space<vmem>>, vector<8x128xf32>,
    } else {
    }
    %c0 = arith.constant 0 : index
    %c0_1 = arith.constant 0 : index
    %c0_2 = arith.constant 0 : index
    %3 = vector.load %arg1[%c0, %c0_1, %c0_2] : memref<1x8x128xf32, #tpu.memory_space<vmem>>, vector<1x8x128xf32>
    %4 = vector.shape_cast %3 : vector<1x8x128xf32> to vector<8x128xf32>
    %c0_3 = arith.constant 0 : index
    %c0_4 = arith.constant 0 : index
    %5 = vector.load %arg5[%c0_3, %c0_4] : memref<8x128xf32, #tpu.memory_space<vmem>>, vector<8x128xf32>
    %c0_5 = arith.constant 0 : index
    %c0_6 = arith.constant 0 : index
    %6 = vector.load %arg6[%c0_5, %c0_6] : memref<8x128xf32, #tpu.memory_space<vmem>>, vector<8x128xf32>
    %c0_7 = arith.constant 0 : index
    %c0_8 = arith.constant 0 : index
    %7 = vector.load %arg2[%c0_7, %c0_8] : memref<128x512xf32, #tpu.memory_space<vmem>>, vector<128x512xf32>
    %cst = arith.constant dense<0.000000e+00> : vector<8x512xf32>
    %8 = tpu.matmul %4, %7, %cst {dimension_numbers = #tpu.dot_dimension_numbers<[1], [0], [0], [1], [0, 0, 1, 1], [], []>} : vector<8x128xf32>, vector<128x512xf32>, vector<8x512xf32> -> vector<8x512xf32>
    %c0_9 = arith.constant 0 : index
    %c0_10 = arith.constant 0 : index
    %9 = vector.load %arg3[%c0_9, %c0_10] : memref<128x512xf32, #tpu.memory_space<vmem>>, vector<128x512xf32>
    %cst_11 = arith.constant dense<0.000000e+00> : vector<8x512xf32>
    %10 = tpu.matmul %5, %9, %cst_11 {dimension_numbers = #tpu.dot_dimension_numbers<[1], [0], [0], [1], [0, 0, 1, 1], [], []>} : vector<8x128xf32>, vector<128x512xf32>, vector<8x512xf32> -> vector<8x512xf32>
    %11 = arith.addf %8, %10 : vector<8x512xf32>
    %c0_12 = arith.constant 0 : index
    %c0_13 = arith.constant 0 : index
    %12 = vector.load %arg4[%c0_12, %c0_13] : memref<1x512xf32, #tpu.memory_space<vmem>>, vector<1x512xf32>
    %13 = vector.broadcast %12 : vector<1x512xf32> to vector<8x512xf32>
    %14 = arith.addf %11, %13 : vector<8x512xf32>
    %15 = vector.extract_strided_slice %14 {offsets = [0, 0], sizes = [8, 128], strides = [1, 1]} : vector<8x512xf32> to vector<8x128xf32>
    %16 = arith.negf %15 : vector<8x128xf32>
    %17 = math.exp %16 : vector<8x128xf32>
    %cst_14 = arith.constant 1.000000e+00 : f32
    %18 = vector.broadcast %cst_14 : f32 to vector<8x128xf32>
    %19 = arith.addf %18, %17 : vector<8x128xf32>
    %20 = arith.divf %18, %19 : vector<8x128xf32>
    %21 = vector.extract_strided_slice %14 {offsets = [0, 128], sizes = [8, 128], strides = [1, 1]} : vector<8x512xf32> to vector<8x128xf32>
    %22 = arith.negf %21 : vector<8x128xf32>
    %23 = math.exp %22 : vector<8x128xf32>
    %cst_15 = arith.constant 1.000000e+00 : f32
    %24 = vector.broadcast %cst_15 : f32 to vector<8x128xf32>
    %25 = arith.addf %24, %23 : vector<8x128xf32>
    %26 = arith.divf %24, %25 : vector<8x128xf32>
    %27 = vector.extract_strided_slice %14 {offsets = [0, 256], sizes = [8, 128], strides = [1, 1]} : vector<8x512xf32> to vector<8x128xf32>
    %28 = math.tanh %27 : vector<8x128xf32>
    %29 = vector.extract_strided_slice %14 {offsets = [0, 384], sizes = [8, 128], strides = [1, 1]} : vector<8x512xf32> to vector<8x128xf32>
    %30 = arith.negf %29 : vector<8x128xf32>
    %31 = math.exp %30 : vector<8x128xf32>
    %cst_16 = arith.constant 1.000000e+00 : f32
    %32 = vector.broadcast %cst_16 : f32 to vector<8x128xf32>
    %33 = arith.addf %32, %31 : vector<8x128xf32>
    %34 = arith.divf %32, %33 : vector<8x128xf32>
    %35 = arith.mulf %26, %6 : vector<8x128xf32>
    %36 = arith.mulf %20, %28 : vector<8x128xf32>
    %37 = arith.addf %35, %36 : vector<8x128xf32>
    %38 = math.tanh %37 : vector<8x128xf32>
    %39 = arith.mulf %34, %38 : vector<8x128xf32>
    %c0_17 = arith.constant 0 : index
    %c0_18 = arith.constant 0 : index
    %40 = vector.load %arg5[%c0_17, %c0_18] : memref<8x128xf32, #tpu.memory_space<vmem>>, vector<8x128xf32>
    tpu.vector_store %arg5[%c0_17, %c0_18], %39 {strides = array<i32>} : memref<8x128xf32, #tpu.memory_space<vmem>>, vector<8x128xf32>,
    %c0_19 = arith.constant 0 : index
    %c0_20 = arith.constant 0 : index
    %41 = vector.load %arg6[%c0_19, %c0_20] : memref<8x128xf32, #tpu.memory_space<vmem>>, vector<8x128xf32>
    tpu.vector_store %arg6[%c0_19, %c0_20], %37 {strides = array<i32>} : memref<8x128xf32, #tpu.memory_space<vmem>>, vector<8x128xf32>,
    return
  }
  func.func @transform_0(%arg0: i32) -> (i32, i32, i32) {
    %c0_i32 = arith.constant 0 : i32
    %c0_i32_0 = arith.constant 0 : i32
    %c0_i32_1 = arith.constant 0 : i32
    return %arg0, %c0_i32, %c0_i32_0 : i32, i32, i32
  }
  func.func @transform_1(%arg0: i32) -> (i32, i32) {
    %c0_i32 = arith.constant 0 : i32
    %c0_i32_0 = arith.constant 0 : i32
    %c0_i32_1 = arith.constant 0 : i32
    return %c0_i32, %c0_i32_0 : i32, i32
  }
  func.func @transform_2(%arg0: i32) -> (i32, i32) {
    %c0_i32 = arith.constant 0 : i32
    %c0_i32_0 = arith.constant 0 : i32
    %c0_i32_1 = arith.constant 0 : i32
    return %c0_i32, %c0_i32_0 : i32, i32
  }
  func.func @transform_3(%arg0: i32) -> (i32, i32) {
    %c0_i32 = arith.constant 0 : i32
    %c0_i32_0 = arith.constant 0 : i32
    %c0_i32_1 = arith.constant 0 : i32
    return %c0_i32, %c0_i32_0 : i32, i32
  }
  func.func @transform_4(%arg0: i32) -> (i32, i32) {
    %c0_i32 = arith.constant 0 : i32
    %c0_i32_0 = arith.constant 0 : i32
    %c0_i32_1 = arith.constant 0 : i32
    return %c0_i32, %c0_i32_0 : i32, i32
  }
  func.func @transform_5(%arg0: i32) -> (i32, i32) {
    %c0_i32 = arith.constant 0 : i32
    %c0_i32_0 = arith.constant 0 : i32
    %c0_i32_1 = arith.constant 0 : i32
    return %c0_i32, %c0_i32_0 : i32, i32
  }
}

module attributes {stable_mosaic.version = 11 : i64} {
  func.func @_decoder_kernel(%arg0: i32, %arg1: memref<1x8x128xf32, #tpu.memory_space<vmem>>, %arg2: memref<8x128xf32, #tpu.memory_space<vmem>>, %arg3: memref<8x128xf32, #tpu.memory_space<vmem>>, %arg4: memref<128x512xf32, #tpu.memory_space<vmem>>, %arg5: memref<128x512xf32, #tpu.memory_space<vmem>>, %arg6: memref<1x512xf32, #tpu.memory_space<vmem>>, %arg7: memref<128x128xf32, #tpu.memory_space<vmem>>, %arg8: memref<1x128xf32, #tpu.memory_space<vmem>>, %arg9: memref<1x8x128xf32, #tpu.memory_space<vmem>>, %arg10: memref<8x128xf32, #tpu.memory_space<vmem>>, %arg11: memref<8x128xf32, #tpu.memory_space<vmem>>) attributes {dimension_semantics = [#tpu.dimension_semantics<arbitrary>], iteration_bounds = array<i64: 5>, scalar_prefetch = 0 : i64, scratch_operands = 2 : i64, tpu.core_type = #tpu.core_type<tc>, window_params = [{transform_indices = @transform_0, window_bounds = array<i64: 1, 8, 128>}, {pipeline_mode = #tpu.pipeline_mode<synchronous>, transform_indices = @transform_1, window_bounds = array<i64: 8, 128>}, {pipeline_mode = #tpu.pipeline_mode<synchronous>, transform_indices = @transform_2, window_bounds = array<i64: 8, 128>}, {pipeline_mode = #tpu.pipeline_mode<synchronous>, transform_indices = @transform_3, window_bounds = array<i64: 128, 512>}, {pipeline_mode = #tpu.pipeline_mode<synchronous>, transform_indices = @transform_4, window_bounds = array<i64: 128, 512>}, {pipeline_mode = #tpu.pipeline_mode<synchronous>, transform_indices = @transform_5, window_bounds = array<i64: 1, 512>}, {pipeline_mode = #tpu.pipeline_mode<synchronous>, transform_indices = @transform_6, window_bounds = array<i64: 128, 128>}, {pipeline_mode = #tpu.pipeline_mode<synchronous>, transform_indices = @transform_7, window_bounds = array<i64: 1, 128>}, {transform_indices = @transform_8, window_bounds = array<i64: 1, 8, 128>}]} {
    %c0_i32 = arith.constant 0 : i32
    %0 = arith.cmpi eq, %arg0, %c0_i32 : i32
    %1 = arith.extui %0 : i1 to i32
    %c0_i32_0 = arith.constant 0 : i32
    %2 = arith.cmpi ne, %1, %c0_i32_0 : i32
    scf.if %2 {
      %c0_29 = arith.constant 0 : index
      %c0_30 = arith.constant 0 : index
      %50 = vector.load %arg2[%c0_29, %c0_30] : memref<8x128xf32, #tpu.memory_space<vmem>>, vector<8x128xf32>
      %c0_31 = arith.constant 0 : index
      %c0_32 = arith.constant 0 : index
      %51 = vector.load %arg10[%c0_31, %c0_32] : memref<8x128xf32, #tpu.memory_space<vmem>>, vector<8x128xf32>
      tpu.vector_store %arg10[%c0_31, %c0_32], %50 {strides = array<i32>} : memref<8x128xf32, #tpu.memory_space<vmem>>, vector<8x128xf32>,
      %c0_33 = arith.constant 0 : index
      %c0_34 = arith.constant 0 : index
      %52 = vector.load %arg3[%c0_33, %c0_34] : memref<8x128xf32, #tpu.memory_space<vmem>>, vector<8x128xf32>
      %c0_35 = arith.constant 0 : index
      %c0_36 = arith.constant 0 : index
      %53 = vector.load %arg11[%c0_35, %c0_36] : memref<8x128xf32, #tpu.memory_space<vmem>>, vector<8x128xf32>
      tpu.vector_store %arg11[%c0_35, %c0_36], %52 {strides = array<i32>} : memref<8x128xf32, #tpu.memory_space<vmem>>, vector<8x128xf32>,
    } else {
    }
    %c0 = arith.constant 0 : index
    %c0_1 = arith.constant 0 : index
    %c0_2 = arith.constant 0 : index
    %3 = vector.load %arg1[%c0, %c0_1, %c0_2] : memref<1x8x128xf32, #tpu.memory_space<vmem>>, vector<1x8x128xf32>
    %4 = vector.shape_cast %3 : vector<1x8x128xf32> to vector<8x128xf32>
    %c0_3 = arith.constant 0 : index
    %c0_4 = arith.constant 0 : index
    %5 = vector.load %arg10[%c0_3, %c0_4] : memref<8x128xf32, #tpu.memory_space<vmem>>, vector<8x128xf32>
    %c0_5 = arith.constant 0 : index
    %c0_6 = arith.constant 0 : index
    %6 = vector.load %arg11[%c0_5, %c0_6] : memref<8x128xf32, #tpu.memory_space<vmem>>, vector<8x128xf32>
    %c0_7 = arith.constant 0 : index
    %c0_8 = arith.constant 0 : index
    %7 = vector.load %arg4[%c0_7, %c0_8] : memref<128x512xf32, #tpu.memory_space<vmem>>, vector<128x512xf32>
    %cst = arith.constant dense<0.000000e+00> : vector<8x512xf32>
    %8 = tpu.matmul %4, %7, %cst {dimension_numbers = #tpu.dot_dimension_numbers<[1], [0], [0], [1], [0, 0, 1, 1], [], []>} : vector<8x128xf32>, vector<128x512xf32>, vector<8x512xf32> -> vector<8x512xf32>
    %c0_9 = arith.constant 0 : index
    %c0_10 = arith.constant 0 : index
    %9 = vector.load %arg5[%c0_9, %c0_10] : memref<128x512xf32, #tpu.memory_space<vmem>>, vector<128x512xf32>
    %cst_11 = arith.constant dense<0.000000e+00> : vector<8x512xf32>
    %10 = tpu.matmul %5, %9, %cst_11 {dimension_numbers = #tpu.dot_dimension_numbers<[1], [0], [0], [1], [0, 0, 1, 1], [], []>} : vector<8x128xf32>, vector<128x512xf32>, vector<8x512xf32> -> vector<8x512xf32>
    %11 = arith.addf %8, %10 : vector<8x512xf32>
    %c0_12 = arith.constant 0 : index
    %c0_13 = arith.constant 0 : index
    %12 = vector.load %arg6[%c0_12, %c0_13] : memref<1x512xf32, #tpu.memory_space<vmem>>, vector<1x512xf32>
    %13 = vector.broadcast %12 : vector<1x512xf32> to vector<8x512xf32>
    %14 = arith.addf %11, %13 : vector<8x512xf32>
    %15 = vector.extract_strided_slice %14 {offsets = [0, 0], sizes = [8, 128], strides = [1, 1]} : vector<8x512xf32> to vector<8x128xf32>
    %16 = arith.negf %15 : vector<8x128xf32>
    %17 = math.exp %16 : vector<8x128xf32>
    %cst_14 = arith.constant 1.000000e+00 : f32
    %18 = vector.broadcast %cst_14 : f32 to vector<8x128xf32>
    %19 = arith.addf %18, %17 : vector<8x128xf32>
    %20 = arith.divf %18, %19 : vector<8x128xf32>
    %21 = vector.extract_strided_slice %14 {offsets = [0, 128], sizes = [8, 128], strides = [1, 1]} : vector<8x512xf32> to vector<8x128xf32>
    %22 = arith.negf %21 : vector<8x128xf32>
    %23 = math.exp %22 : vector<8x128xf32>
    %cst_15 = arith.constant 1.000000e+00 : f32
    %24 = vector.broadcast %cst_15 : f32 to vector<8x128xf32>
    %25 = arith.addf %24, %23 : vector<8x128xf32>
    %26 = arith.divf %24, %25 : vector<8x128xf32>
    %27 = vector.extract_strided_slice %14 {offsets = [0, 256], sizes = [8, 128], strides = [1, 1]} : vector<8x512xf32> to vector<8x128xf32>
    %28 = math.tanh %27 : vector<8x128xf32>
    %29 = vector.extract_strided_slice %14 {offsets = [0, 384], sizes = [8, 128], strides = [1, 1]} : vector<8x512xf32> to vector<8x128xf32>
    %30 = arith.negf %29 : vector<8x128xf32>
    %31 = math.exp %30 : vector<8x128xf32>
    %cst_16 = arith.constant 1.000000e+00 : f32
    %32 = vector.broadcast %cst_16 : f32 to vector<8x128xf32>
    %33 = arith.addf %32, %31 : vector<8x128xf32>
    %34 = arith.divf %32, %33 : vector<8x128xf32>
    %35 = arith.mulf %26, %6 : vector<8x128xf32>
    %36 = arith.mulf %20, %28 : vector<8x128xf32>
    %37 = arith.addf %35, %36 : vector<8x128xf32>
    %38 = math.tanh %37 : vector<8x128xf32>
    %39 = arith.mulf %34, %38 : vector<8x128xf32>
    %c0_17 = arith.constant 0 : index
    %c0_18 = arith.constant 0 : index
    %40 = vector.load %arg10[%c0_17, %c0_18] : memref<8x128xf32, #tpu.memory_space<vmem>>, vector<8x128xf32>
    tpu.vector_store %arg10[%c0_17, %c0_18], %39 {strides = array<i32>} : memref<8x128xf32, #tpu.memory_space<vmem>>, vector<8x128xf32>,
    %c0_19 = arith.constant 0 : index
    %c0_20 = arith.constant 0 : index
    %41 = vector.load %arg11[%c0_19, %c0_20] : memref<8x128xf32, #tpu.memory_space<vmem>>, vector<8x128xf32>
    tpu.vector_store %arg11[%c0_19, %c0_20], %37 {strides = array<i32>} : memref<8x128xf32, #tpu.memory_space<vmem>>, vector<8x128xf32>,
    %c0_21 = arith.constant 0 : index
    %c0_22 = arith.constant 0 : index
    %42 = vector.load %arg7[%c0_21, %c0_22] : memref<128x128xf32, #tpu.memory_space<vmem>>, vector<128x128xf32>
    %cst_23 = arith.constant dense<0.000000e+00> : vector<8x128xf32>
    %43 = tpu.matmul %39, %42, %cst_23 {dimension_numbers = #tpu.dot_dimension_numbers<[1], [0], [0], [1], [0, 0, 1, 1], [], []>} : vector<8x128xf32>, vector<128x128xf32>, vector<8x128xf32> -> vector<8x128xf32>
    %c0_24 = arith.constant 0 : index
    %c0_25 = arith.constant 0 : index
    %44 = vector.load %arg8[%c0_24, %c0_25] : memref<1x128xf32, #tpu.memory_space<vmem>>, vector<1x128xf32>
    %45 = vector.broadcast %44 : vector<1x128xf32> to vector<8x128xf32>
    %46 = arith.addf %43, %45 : vector<8x128xf32>
    %c0_26 = arith.constant 0 : index
    %c0_27 = arith.constant 0 : index
    %c0_28 = arith.constant 0 : index
    %47 = vector.load %arg9[%c0_26, %c0_27, %c0_28] : memref<1x8x128xf32, #tpu.memory_space<vmem>>, vector<1x8x128xf32>
    %48 = vector.shape_cast %47 : vector<1x8x128xf32> to vector<8x128xf32>
    %49 = vector.shape_cast %46 : vector<8x128xf32> to vector<1x8x128xf32>
    tpu.vector_store %arg9[%c0_26, %c0_27, %c0_28], %49 {strides = array<i32>} : memref<1x8x128xf32, #tpu.memory_space<vmem>>, vector<1x8x128xf32>,
    return
  }
  func.func @transform_0(%arg0: i32) -> (i32, i32, i32) {
    %c0_i32 = arith.constant 0 : i32
    %c0_i32_0 = arith.constant 0 : i32
    %c0_i32_1 = arith.constant 0 : i32
    return %arg0, %c0_i32, %c0_i32_0 : i32, i32, i32
  }
  func.func @transform_1(%arg0: i32) -> (i32, i32) {
    %c0_i32 = arith.constant 0 : i32
    %c0_i32_0 = arith.constant 0 : i32
    %c0_i32_1 = arith.constant 0 : i32
    return %c0_i32, %c0_i32_0 : i32, i32
  }
  func.func @transform_2(%arg0: i32) -> (i32, i32) {
    %c0_i32 = arith.constant 0 : i32
    %c0_i32_0 = arith.constant 0 : i32
    %c0_i32_1 = arith.constant 0 : i32
    return %c0_i32, %c0_i32_0 : i32, i32
  }
  func.func @transform_3(%arg0: i32) -> (i32, i32) {
    %c0_i32 = arith.constant 0 : i32
    %c0_i32_0 = arith.constant 0 : i32
    %c0_i32_1 = arith.constant 0 : i32
    return %c0_i32, %c0_i32_0 : i32, i32
  }
  func.func @transform_4(%arg0: i32) -> (i32, i32) {
    %c0_i32 = arith.constant 0 : i32
    %c0_i32_0 = arith.constant 0 : i32
    %c0_i32_1 = arith.constant 0 : i32
    return %c0_i32, %c0_i32_0 : i32, i32
  }
  func.func @transform_5(%arg0: i32) -> (i32, i32) {
    %c0_i32 = arith.constant 0 : i32
    %c0_i32_0 = arith.constant 0 : i32
    %c0_i32_1 = arith.constant 0 : i32
    return %c0_i32, %c0_i32_0 : i32, i32
  }
  func.func @transform_6(%arg0: i32) -> (i32, i32) {
    %c0_i32 = arith.constant 0 : i32
    %c0_i32_0 = arith.constant 0 : i32
    %c0_i32_1 = arith.constant 0 : i32
    return %c0_i32, %c0_i32_0 : i32, i32
  }
  func.func @transform_7(%arg0: i32) -> (i32, i32) {
    %c0_i32 = arith.constant 0 : i32
    %c0_i32_0 = arith.constant 0 : i32
    %c0_i32_1 = arith.constant 0 : i32
    return %c0_i32, %c0_i32_0 : i32, i32
  }
  func.func @transform_8(%arg0: i32) -> (i32, i32, i32) {
    %c0_i32 = arith.constant 0 : i32
    %c0_i32_0 = arith.constant 0 : i32
    %c0_i32_1 = arith.constant 0 : i32
    return %arg0, %c0_i32, %c0_i32_0 : i32, i32, i32
  }
}

</mosaic_0001>

<bundles_post_ra>
// kernel: seq2seq_forward.3
= control target key start
LH: loop header
LB: loop body
LE: loop exit
PB: predicated region body
PF: predicated region fallthrough
CT: control target
= control target key end

     0   :  { %13 = vsyncpa [#allocation5], 0  ;;  %s945_s27 = smov 0   ;;  %s1224_s0 = inlined_call_operand.vmem [shape: f32[5,8,128], index: 0, kind: input, shape index: {}]   ;;  %s1225_s1 = inlined_call_operand.vmem [shape: f32[8,128], index: 1, kind: input, shape index: {}]   ;;  %s1226_s2 = inlined_call_operand.vmem [shape: f32[8,128], index: 2, kind: input, shape index: {}]   ;;  %s1227_s3 = inlined_call_operand.vmem [shape: f32[128,512], index: 3, kind: input, shape index: {}]   ;;  %s1228_s4 = inlined_call_operand.hbm [shape: f32[128,512], index: 4, kind: input, shape index: {}]   ;;  %s1229_s5 = inlined_call_operand.vmem [shape: f32[1,512], index: 5, kind: input, shape index: {}]   ;;  %s1230_s6 = inlined_call_operand.vmem [shape: f32[128,128], index: 6, kind: input, shape index: {}]   ;;  %s1231_s7 = inlined_call_operand.vmem [shape: f32[1,128], index: 7, kind: input, shape index: {}]   ;;  %s1232_s8 = inlined_call_operand.vmem [shape: f32[5,8,128], index: 8, kind: output, shape index: {}]  }
   0x1 LB: > { %s243_s30 = sshll.u32 %s1228_s4, 4  ;;  %s802_s9 = sadd.s32 4294967295, %s895_s27   ;;  %s895_s27 = sphi %s945_s27, %s19_s27   ;;  %s244_s30 = int_to_ptr.hbm [resolvable:$true] %s243_s30 }
   0x2   : > { %p804_p0 = scmp.ge.s32.totalorder %s895_s27, 1  ;;  %p223_p1 = scmp.lt.s32.totalorder %s895_s27, 6 }
   0x3   : > { %p805_p2 = scmp.ne.s32.totalorder %s802_s9, 0  ;;  %p825_p3 = scmp.eq.s32.totalorder %s802_s9, 0 }
   0x4   : > { %p224_p4 = pnand %p804_p0, %p223_p1  ;;  %s897_s10 = smov [#allocation4]  }
   0x5   : > { %s245_s11 = sshll.u32 %s897_s10, 4  ;;  %s898_s12 = smov 512   ;;  %s246_s11 = int_to_ptr.vmem [resolvable:$true] %s245_s11 }
   0x6   : > { %p821_p5 = pneg %p224_p4  ;;  %s899_s13 = smov 32  }
   0x7   : > { %277 = sbr.rel (%p224_p4) target bundleno = 388 (0x184), region = 52 }
   0x8   : > { %p822_p6 = pnand %p825_p3, %p821_p5 }
   0xa   : > { %824 = dma.hbm_to_vmem [thread:$0]  (!%p822_p6), %s244_s30, 8192, %s246_s11, [#allocation5], %s898_s12, %s898_s12, %s899_s13  }
   0xc   : > { %890 = dma.done.wait (%p825_p3), [#allocation5], 8192  }
   0xd   : > { %892 = vsyncadd (%p825_p3), [#allocation5], 4294959104  ;;  %p310_p7 = scmp.lt.s32.totalorder %s802_s9, 4 }
   0xe   : > { %321 = sbr.rel (%p805_p2) target bundleno = 22 (0x16), region = 60 }
   0xf   : > { %s311_s14 = scalar_select %p310_p7, %s802_s9, 4 }
  0x11   : > { %s809_s15 = sshll.u32 %s311_s14, 3 }
  0x12   : > { %s959_s18 = scalar_lea.vmem %s1224_s0, %s809_s15  ;;  %s964_s21 = scalar_lea.vmem %s1232_s8, %s809_s15 }
  0x13   : > { %v322_v0 = vld [vmem:[%s1225_s1] sm:$0xff] }
  0x14   : > { %v324_v1 = vld [vmem:[%s1226_s2] sm:$0xff]  ;;  %323 = vst [vmem:[#allocation2] sm:$0xff] %v322_v0 }
  0x15   : > { %325 = vst [vmem:[#allocation3] sm:$0xff] %v324_v1 }
  0x16 PF: > { %v453_v2 = vld [vmem:[#allocation4 + $0x1e0] sm:$0xff]  ;;  %v454_v3 = vld [vmem:[#allocation4 + $0x1e8] sm:$0xff]  ;;  %v456_v4 = vld [vmem:[#allocation4 + $0x1f8] sm:$0xff] }
  0x17   : > { %457 = vmatpush.msra.mxu0 %v453_v2  ;;  %477 = vmatpush.msra.mxu1 %v454_v3  ;;  %v449_v5 = vld [vmem:[#allocation4 + $0x1c0] sm:$0xff]  ;;  %v450_v6 = vld [vmem:[#allocation4 + $0x1c8] sm:$0xff]  ;;  %v452_v7 = vld [vmem:[#allocation4 + $0x1d8] sm:$0xff] }
  0x18   : > { %517 = vmatpush.msra.mxu3 %v456_v4  ;;  %v445_v8 = vld [vmem:[#allocation4 + $0x1a0] sm:$0xff]  ;;  %v446_v9 = vld [vmem:[#allocation4 + $0x1a8] sm:$0xff]  ;;  %v448_v10 = vld [vmem:[#allocation4 + $0x1b8] sm:$0xff] }
  0x19   : > { %458 = vmatpush.msra.mxu0 %v449_v5  ;;  %478 = vmatpush.msra.mxu1 %v450_v6  ;;  %v441_v11 = vld [vmem:[#allocation4 + $0x180] sm:$0xff]  ;;  %v442_v12 = vld [vmem:[#allocation4 + $0x188] sm:$0xff]  ;;  %v455_v13 = vld [vmem:[#allocation4 + $0x1f0] sm:$0xff] }
  0x1a   : > { %518 = vmatpush.msra.mxu3 %v452_v7  ;;  %v444_v14 = vld [vmem:[#allocation4 + $0x198] sm:$0xff]  ;;  %v451_v15 = vld [vmem:[#allocation4 + $0x1d0] sm:$0xff]  ;;  %497 = vmatpush.msra.mxu2 %v455_v13  ;;  %v437_v16 = vld [vmem:[#allocation4 + $0x160] sm:$0xff] }
  0x1b   : > { %459 = vmatpush.msra.mxu0 %v445_v8  ;;  %479 = vmatpush.msra.mxu1 %v446_v9  ;;  %v438_v17 = vld [vmem:[#allocation4 + $0x168] sm:$0xff]  ;;  %v440_v18 = vld [vmem:[#allocation4 + $0x178] sm:$0xff]  ;;  %v447_v19 = vld [vmem:[#allocation4 + $0x1b0] sm:$0xff] }
  0x1c   : > { %519 = vmatpush.msra.mxu3 %v448_v10  ;;  %498 = vmatpush.msra.mxu2 %v451_v15  ;;  %v433_v20 = vld [vmem:[#allocation4 + $0x140] sm:$0xff]  ;;  %v434_v21 = vld [vmem:[#allocation4 + $0x148] sm:$0xff]  ;;  %v436_v22 = vld [vmem:[#allocation4 + $0x158] sm:$0xff] }
  0x1d   : > { %460 = vmatpush.msra.mxu0 %v441_v11  ;;  %480 = vmatpush.msra.mxu1 %v442_v12  ;;  %v443_v23 = vld [vmem:[#allocation4 + $0x190] sm:$0xff]  ;;  %v429_v24 = vld [vmem:[#allocation4 + $0x120] sm:$0xff]  ;;  %v430_v25 = vld [vmem:[#allocation4 + $0x128] sm:$0xff] }
  0x1e   : > { %520 = vmatpush.msra.mxu3 %v444_v14  ;;  %499 = vmatpush.msra.mxu2 %v447_v19  ;;  %v432_v26 = vld [vmem:[#allocation4 + $0x138] sm:$0xff]  ;;  %v439_v27 = vld [vmem:[#allocation4 + $0x170] sm:$0xff]  ;;  %v425_v28 = vld [vmem:[#allocation4 + $0x100] sm:$0xff] }
  0x1f   : > { %461 = vmatpush.msra.mxu0 %v437_v16  ;;  %481 = vmatpush.msra.mxu1 %v438_v17  ;;  %v426_v29 = vld [vmem:[#allocation4 + $0x108] sm:$0xff]  ;;  %v428_v30 = vld [vmem:[#allocation4 + $0x118] sm:$0xff]  ;;  %v435_v31 = vld [vmem:[#allocation4 + $0x150] sm:$0xff] }
  0x20   : > { %521 = vmatpush.msra.mxu3 %v440_v18  ;;  %500 = vmatpush.msra.mxu2 %v443_v23  ;;  %v421_v32 = vld [vmem:[#allocation4 + $0xe0] sm:$0xff]  ;;  %v422_v33 = vld [vmem:[#allocation4 + $0xe8] sm:$0xff]  ;;  %v424_v34 = vld [vmem:[#allocation4 + $0xf8] sm:$0xff] }
  0x21   : > { %462 = vmatpush.msra.mxu0 %v433_v20  ;;  %482 = vmatpush.msra.mxu1 %v434_v21  ;;  %v431_v35 = vld [vmem:[#allocation4 + $0x130] sm:$0xff]  ;;  %v417_v36 = vld [vmem:[#allocation4 + $0xc0] sm:$0xff]  ;;  %v418_v37 = vld [vmem:[#allocation4 + $0xc8] sm:$0xff] }
  0x22   : > { %522 = vmatpush.msra.mxu3 %v436_v22  ;;  %501 = vmatpush.msra.mxu2 %v439_v27  ;;  %v420_v38 = vld [vmem:[#allocation4 + $0xd8] sm:$0xff]  ;;  %v427_v39 = vld [vmem:[#allocation4 + $0x110] sm:$0xff]  ;;  %v413_v40 = vld [vmem:[#allocation4 + $0xa0] sm:$0xff] }
  0x23   : > { %463 = vmatpush.msra.mxu0 %v429_v24  ;;  %483 = vmatpush.msra.mxu1 %v430_v25  ;;  %v414_v41 = vld [vmem:[#allocation4 + $0xa8] sm:$0xff]  ;;  %v416_v42 = vld [vmem:[#allocation4 + $0xb8] sm:$0xff]  ;;  %v423_v43 = vld [vmem:[#allocation4 + $0xf0] sm:$0xff] }
  0x24   : > { %523 = vmatpush.msra.mxu3 %v432_v26  ;;  %502 = vmatpush.msra.mxu2 %v435_v31  ;;  %v409_v44 = vld [vmem:[#allocation4 + $0x80] sm:$0xff]  ;;  %v410_v45 = vld [vmem:[#allocation4 + $0x88] sm:$0xff]  ;;  %v412_v46 = vld [vmem:[#allocation4 + $0x98] sm:$0xff] }
  0x25   : > { %464 = vmatpush.msra.mxu0 %v425_v28  ;;  %484 = vmatpush.msra.mxu1 %v426_v29  ;;  %v419_v47 = vld [vmem:[#allocation4 + $0xd0] sm:$0xff]  ;;  %v405_v48 = vld [vmem:[#allocation4 + $0x60] sm:$0xff]  ;;  %v406_v49 = vld [vmem:[#allocation4 + $0x68] sm:$0xff] }
  0x26   : > { %524 = vmatpush.msra.mxu3 %v428_v30  ;;  %503 = vmatpush.msra.mxu2 %v431_v35  ;;  %v408_v50 = vld [vmem:[#allocation4 + $0x78] sm:$0xff]  ;;  %v415_v51 = vld [vmem:[#allocation4 + $0xb0] sm:$0xff]  ;;  %v401_v52 = vld [vmem:[#allocation4 + $0x40] sm:$0xff] }
  0x27   : > { %465 = vmatpush.msra.mxu0 %v421_v32  ;;  %485 = vmatpush.msra.mxu1 %v422_v33  ;;  %v402_v53 = vld [vmem:[#allocation4 + $0x48] sm:$0xff]  ;;  %v404_v54 = vld [vmem:[#allocation4 + $0x58] sm:$0xff]  ;;  %v411_v55 = vld [vmem:[#allocation4 + $0x90] sm:$0xff] }
  0x28   : > { %525 = vmatpush.msra.mxu3 %v424_v34  ;;  %504 = vmatpush.msra.mxu2 %v427_v39  ;;  %v397_v56 = vld [vmem:[#allocation4 + $0x20] sm:$0xff]  ;;  %v398_v57 = vld [vmem:[#allocation4 + $0x28] sm:$0xff]  ;;  %v400_v58 = vld [vmem:[#allocation4 + $0x38] sm:$0xff] }
  0x29   : > { %466 = vmatpush.msra.mxu0 %v417_v36  ;;  %486 = vmatpush.msra.mxu1 %v418_v37  ;;  %v407_v59 = vld [vmem:[#allocation4 + $0x70] sm:$0xff]  ;;  %v393_v60 = vld [vmem:[#allocation4] sm:$0xff]  ;;  %v394_v61 = vld [vmem:[#allocation4 + $0x8] sm:$0xff] }
  0x2a   : > { %526 = vmatpush.msra.mxu3 %v420_v38  ;;  %505 = vmatpush.msra.mxu2 %v423_v43  ;;  %v396_v62 = vld [vmem:[#allocation4 + $0x18] sm:$0xff]  ;;  %v389_v63 = vld [vmem:[%s1227_s3 + $0x1e0] sm:$0xff]  ;;  %v392_v1 = vld [vmem:[%s1227_s3 + $0x1f8] sm:$0xff] }
  0x2b   : > { %467 = vmatpush.msra.mxu0 %v413_v40  ;;  %487 = vmatpush.msra.mxu1 %v414_v41  ;;  %v390_v0 = vld [vmem:[%s1227_s3 + $0x1e8] sm:$0xff]  ;;  %v403_v2 = vld [vmem:[#allocation4 + $0x50] sm:$0xff]  ;;  %v388_v5 = vld [vmem:[%s1227_s3 + $0x1d8] sm:$0xff] }
  0x2c   : > { %527 = vmatpush.msra.mxu3 %v416_v42  ;;  %506 = vmatpush.msra.mxu2 %v419_v47  ;;  %v385_v3 = vld [vmem:[%s1227_s3 + $0x1c0] sm:$0xff]  ;;  %v386_v4 = vld [vmem:[%s1227_s3 + $0x1c8] sm:$0xff]  ;;  %v384_v9 = vld [vmem:[%s1227_s3 + $0x1b8] sm:$0xff] }
  0x2d   : > { %468 = vmatpush.msra.mxu0 %v409_v44  ;;  %488 = vmatpush.msra.mxu1 %v410_v45  ;;  %v399_v6 = vld [vmem:[#allocation4 + $0x30] sm:$0xff]  ;;  %v382_v8 = vld [vmem:[%s1227_s3 + $0x1a8] sm:$0xff]  ;;  %v380_v13 = vld [vmem:[%s1227_s3 + $0x198] sm:$0xff] }
  0x2e   : > { %528 = vmatpush.msra.mxu3 %v412_v46  ;;  %507 = vmatpush.msra.mxu2 %v415_v51  ;;  %v381_v7 = vld [vmem:[%s1227_s3 + $0x1a0] sm:$0xff]  ;;  %v378_v12 = vld [vmem:[%s1227_s3 + $0x188] sm:$0xff]  ;;  %v391_v14 = vld [vmem:[%s1227_s3 + $0x1f0] sm:$0xff] }
  0x2f   : > { %469 = vmatpush.msra.mxu0 %v405_v48  ;;  %489 = vmatpush.msra.mxu1 %v406_v49  ;;  %v395_v10 = vld [vmem:[#allocation4 + $0x10] sm:$0xff]  ;;  %v374_v16 = vld [vmem:[%s1227_s3 + $0x168] sm:$0xff]  ;;  %v376_v17 = vld [vmem:[%s1227_s3 + $0x178] sm:$0xff] }
  0x30   : > { %529 = vmatpush.msra.mxu3 %v408_v50  ;;  %508 = vmatpush.msra.mxu2 %v411_v55  ;;  %v377_v11 = vld [vmem:[%s1227_s3 + $0x180] sm:$0xff]  ;;  %v387_v18 = vld [vmem:[%s1227_s3 + $0x1d0] sm:$0xff]  ;;  %v370_v20 = vld [vmem:[%s1227_s3 + $0x148] sm:$0xff] }
  0x31   : > { %470 = vmatpush.msra.mxu0 %v401_v52  ;;  %490 = vmatpush.msra.mxu1 %v402_v53  ;;  %v373_v15 = vld [vmem:[%s1227_s3 + $0x160] sm:$0xff]  ;;  %v372_v21 = vld [vmem:[%s1227_s3 + $0x158] sm:$0xff]  ;;  %v383_v22 = vld [vmem:[%s1227_s3 + $0x1b0] sm:$0xff] }
  0x32   : > { %530 = vmatpush.msra.mxu3 %v404_v54  ;;  %509 = vmatpush.msra.mxu2 %v407_v59  ;;  %v369_v19 = vld [vmem:[%s1227_s3 + $0x140] sm:$0xff]  ;;  %v366_v24 = vld [vmem:[%s1227_s3 + $0x128] sm:$0xff]  ;;  %v368_v25 = vld [vmem:[%s1227_s3 + $0x138] sm:$0xff] }
  0x33   : > { %471 = vmatpush.msra.mxu0 %v397_v56  ;;  %491 = vmatpush.msra.mxu1 %v398_v57  ;;  %v365_v23 = vld [vmem:[%s1227_s3 + $0x120] sm:$0xff]  ;;  %v379_v26 = vld [vmem:[%s1227_s3 + $0x190] sm:$0xff]  ;;  %v362_v28 = vld [vmem:[%s1227_s3 + $0x108] sm:$0xff] }
  0x34   : > { %531 = vmatpush.msra.mxu3 %v400_v58  ;;  %510 = vmatpush.msra.mxu2 %v403_v2  ;;  %v361_v27 = vld [vmem:[%s1227_s3 + $0x100] sm:$0xff]  ;;  %v364_v29 = vld [vmem:[%s1227_s3 + $0x118] sm:$0xff]  ;;  %v375_v30 = vld [vmem:[%s1227_s3 + $0x170] sm:$0xff] }
  0x35   : > { %472 = vmatpush.msra.mxu0 %v393_v60  ;;  %492 = vmatpush.msra.mxu1 %v394_v61  ;;  %v357_v31 = vld [vmem:[%s1227_s3 + $0xe0] sm:$0xff]  ;;  %v358_v32 = vld [vmem:[%s1227_s3 + $0xe8] sm:$0xff]  ;;  %v360_v33 = vld [vmem:[%s1227_s3 + $0xf8] sm:$0xff] }
  0x36   : > { %532 = vmatpush.msra.mxu3 %v396_v62  ;;  %511 = vmatpush.msra.mxu2 %v399_v6  ;;  %v371_v34 = vld [vmem:[%s1227_s3 + $0x150] sm:$0xff]  ;;  %v353_v35 = vld [vmem:[%s1227_s3 + $0xc0] sm:$0xff]  ;;  %v354_v36 = vld [vmem:[%s1227_s3 + $0xc8] sm:$0xff] }
  0x37   : > { %537 = vmatpush.msrb.mxu0 %v389_v63  ;;  %557 = vmatpush.msrb.mxu1 %v390_v0  ;;  %v356_v37 = vld [vmem:[%s1227_s3 + $0xd8] sm:$0xff]  ;;  %v367_v38 = vld [vmem:[%s1227_s3 + $0x130] sm:$0xff]  ;;  %v349_v39 = vld [vmem:[%s1227_s3 + $0xa0] sm:$0xff] }
  0x38   : > { %597 = vmatpush.msrb.mxu3 %v392_v1  ;;  %512 = vmatpush.msra.mxu2 %v395_v10  ;;  %v350_v40 = vld [vmem:[%s1227_s3 + $0xa8] sm:$0xff]  ;;  %v352_v41 = vld [vmem:[%s1227_s3 + $0xb8] sm:$0xff]  ;;  %v363_v42 = vld [vmem:[%s1227_s3 + $0x110] sm:$0xff] }
  0x39   : > { %538 = vmatpush.msrb.mxu0 %v385_v3  ;;  %558 = vmatpush.msrb.mxu1 %v386_v4  ;;  %v345_v43 = vld [vmem:[%s1227_s3 + $0x80] sm:$0xff]  ;;  %v346_v44 = vld [vmem:[%s1227_s3 + $0x88] sm:$0xff]  ;;  %v348_v45 = vld [vmem:[%s1227_s3 + $0x98] sm:$0xff] }
  0x3a   : > { %598 = vmatpush.msrb.mxu3 %v388_v5  ;;  %577 = vmatpush.msrb.mxu2 %v391_v14  ;;  %v327_v46 = vld [vmem:[#allocation2] sm:$0xff]  ;;  %v359_v47 = vld [vmem:[%s1227_s3 + $0xf0] sm:$0xff]  ;;  %v342_v49 = vld [vmem:[%s1227_s3 + $0x68] sm:$0xff] }
  0x3b   : > { %539 = vmatpush.msrb.mxu0 %v381_v7  ;;  %559 = vmatpush.msrb.mxu1 %v382_v8  ;;  %v341_v48 = vld [vmem:[%s1227_s3 + $0x60] sm:$0xff]  ;;  %v344_v50 = vld [vmem:[%s1227_s3 + $0x78] sm:$0xff]  ;;  %v355_v51 = vld [vmem:[%s1227_s3 + $0xd0] sm:$0xff] }
  0x3c   : > { %599 = vmatpush.msrb.mxu3 %v384_v9  ;;  %578 = vmatpush.msrb.mxu2 %v387_v18  ;;  %v337_v52 = vld [vmem:[%s1227_s3 + $0x40] sm:$0xff]  ;;  %v338_v53 = vld [vmem:[%s1227_s3 + $0x48] sm:$0xff]  ;;  %v340_v54 = vld [vmem:[%s1227_s3 + $0x58] sm:$0xff] }
  0x3d   : > { %540 = vmatpush.msrb.mxu0 %v377_v11  ;;  %560 = vmatpush.msrb.mxu1 %v378_v12  ;;  %v351_v55 = vld [vmem:[%s1227_s3 + $0xb0] sm:$0xff]  ;;  %v333_v56 = vld [vmem:[%s1227_s3 + $0x20] sm:$0xff]  ;;  %v334_v57 = vld [vmem:[%s1227_s3 + $0x28] sm:$0xff] }
  0x3e   : > { %600 = vmatpush.msrb.mxu3 %v380_v13  ;;  %579 = vmatpush.msrb.mxu2 %v383_v22  ;;  %v336_v58 = vld [vmem:[%s1227_s3 + $0x38] sm:$0xff]  ;;  %v347_v59 = vld [vmem:[%s1227_s3 + $0x90] sm:$0xff]  ;;  %v329_v60 = vld [vmem:[%s1227_s3] sm:$0xff] }
  0x3f   : > { %541 = vmatpush.msrb.mxu0 %v373_v15  ;;  %561 = vmatpush.msrb.mxu1 %v374_v16  ;;  %v330_v61 = vld [vmem:[%s1227_s3 + $0x8] sm:$0xff]  ;;  %v332_v62 = vld [vmem:[%s1227_s3 + $0x18] sm:$0xff]  ;;  %v326_v63 = vld [vmem:[%s959_s18] sm:$0xff] }
  0x40   : > { %601 = vmatpush.msrb.mxu3 %v376_v17  ;;  %580 = vmatpush.msrb.mxu2 %v379_v26  ;;  %v343_v0 = vld [vmem:[%s1227_s3 + $0x70] sm:$0xff]  ;;  %v711_v4 = vld [vmem:[%s1230_s6 + $0x78] sm:$0xff]  ;;  %v709_v6 = vld [vmem:[%s1230_s6 + $0x68] sm:$0xff] }
  0x41   : > { %542 = vmatpush.msrb.mxu0 %v369_v19  ;;  %562 = vmatpush.msrb.mxu1 %v370_v20  ;;  %v339_v1 = vld [vmem:[%s1227_s3 + $0x50] sm:$0xff]  ;;  %v708_v9 = vld [vmem:[%s1230_s6 + $0x60] sm:$0xff]  ;;  %v707_v10 = vld [vmem:[%s1230_s6 + $0x58] sm:$0xff] }
  0x42   : > { %602 = vmatpush.msrb.mxu3 %v372_v21  ;;  %581 = vmatpush.msrb.mxu2 %v375_v30  ;;  %v335_v2 = vld [vmem:[%s1227_s3 + $0x30] sm:$0xff]  ;;  %v617_v12 = vld [vmem:[%s1229_s5] sm:$0xf]  ;;  %v705_v13 = vld [vmem:[%s1230_s6 + $0x48] sm:$0xff] }
  0x43   : > { %543 = vmatpush.msrb.mxu0 %v365_v23  ;;  %563 = vmatpush.msrb.mxu1 %v366_v24  ;;  %v331_v3 = vld [vmem:[%s1227_s3 + $0x10] sm:$0xff]  ;;  %v704_v15 = vld [vmem:[%s1230_s6 + $0x40] sm:$0xff]  ;;  %v619_v16 = vperm.slane %v617_v12, 0  ;;  %v620_v17 = vperm.slane %v617_v12, 1  ;;  %v703_v20 = vld [vmem:[%s1230_s6 + $0x38] sm:$0xff]  ;;  %v622_v30 = vperm.slane %v617_v12, 3 }
  0x44   : > { %603 = vmatpush.msrb.mxu3 %v368_v25  ;;  %582 = vmatpush.msrb.mxu2 %v371_v34  ;;  %v710_v5 = vld [vmem:[%s1230_s6 + $0x70] sm:$0xff]  ;;  %v701_v26 = vld [vmem:[%s1230_s6 + $0x28] sm:$0xff] }
  0x45   : > { %544 = vmatpush.msrb.mxu0 %v361_v27  ;;  %564 = vmatpush.msrb.mxu1 %v362_v28  ;;  %v706_v11 = vld [vmem:[%s1230_s6 + $0x50] sm:$0xff] }
  0x46   : > { %604 = vmatpush.msrb.mxu3 %v364_v29  ;;  %583 = vmatpush.msrb.mxu2 %v367_v38  ;;  %v702_v23 = vld [vmem:[%s1230_s6 + $0x30] sm:$0xff] }
  0x47   : > { %545 = vmatpush.msrb.mxu0 %v357_v31  ;;  %565 = vmatpush.msrb.mxu1 %v358_v32  ;;  %v700_v31 = vld [vmem:[%s1230_s6 + $0x20] sm:$0xff]  ;;  %v699_v32 = vld [vmem:[%s1230_s6 + $0x18] sm:$0xff] }
  0x48   : > { %605 = vmatpush.msrb.mxu3 %v360_v33  ;;  %584 = vmatpush.msrb.mxu2 %v363_v42 }
  0x49   : > { %546 = vmatpush.msrb.mxu0 %v353_v35  ;;  %566 = vmatpush.msrb.mxu1 %v354_v36  ;;  %v698_v35 = vld [vmem:[%s1230_s6 + $0x10] sm:$0xff] }
  0x4a   : > { %606 = vmatpush.msrb.mxu3 %v356_v37  ;;  %473 = vmatmul.f32.vlgmr.msra.gmra.mxu0 %v327_v46  ;;  %v697_v37 = vld [vmem:[%s1230_s6 + $0x8] sm:$0xff] }
  0x4b   : > { %547 = vmatpush.msrb.mxu0 %v349_v39  ;;  %567 = vmatpush.msrb.mxu1 %v350_v40  ;;  %v696_v39 = vld [vmem:[%s1230_s6] sm:$0xff] }
  0x4c   : > { %607 = vmatpush.msrb.mxu3 %v352_v41  ;;  %493 = vmatmul.f32.vlgmr.msra.gmra.mxu1 %v327_v46 }
  0x4d   : > { %548 = vmatpush.msrb.mxu0 %v345_v43  ;;  %568 = vmatpush.msrb.mxu1 %v346_v44 }
  0x4e   : > { %608 = vmatpush.msrb.mxu3 %v348_v45  ;;  %585 = vmatpush.msrb.mxu2 %v359_v47 }
  0x4f   : > { %533 = vmatmul.f32.vlgmr.msra.gmra.mxu3 %v327_v46  ;;  %549 = vmatpush.msrb.mxu0 %v341_v48 }
  0x50   : > { %569 = vmatpush.msrb.mxu1 %v342_v49  ;;  %609 = vmatpush.msrb.mxu3 %v344_v50 }
  0x51   : > { %586 = vmatpush.msrb.mxu2 %v355_v51  ;;  %550 = vmatpush.msrb.mxu0 %v337_v52 }
  0x52   : > { %570 = vmatpush.msrb.mxu1 %v338_v53  ;;  %610 = vmatpush.msrb.mxu3 %v340_v54 }
  0x53   : > { %587 = vmatpush.msrb.mxu2 %v351_v55  ;;  %551 = vmatpush.msrb.mxu0 %v333_v56 }
  0x54   : > { %571 = vmatpush.msrb.mxu1 %v334_v57  ;;  %611 = vmatpush.msrb.mxu3 %v336_v58 }
  0x55   : > { %588 = vmatpush.msrb.mxu2 %v347_v59  ;;  %552 = vmatpush.msrb.mxu0 %v329_v60 }
  0x56   : > { %513 = vmatmul.f32.vlgmr.msra.gmra.mxu2 %v327_v46  ;;  %572 = vmatpush.msrb.mxu1 %v330_v61  ;;  %v621_v46 = vperm.slane %v617_v12, 2 }
  0x57   : > { %612 = vmatpush.msrb.mxu3 %v332_v62  ;;  %553 = vmatmul.f32.vlgmr.msrb.gmra.mxu0 %v326_v63 }
  0x58   : > { %573 = vmatmul.f32.vlgmr.msrb.gmra.mxu1 %v326_v63  ;;  %589 = vmatpush.msrb.mxu2 %v343_v0 }
  0x59   : > { %613 = vmatmul.f32.vlgmr.msrb.gmra.mxu3 %v326_v63  ;;  %716 = vmatpush.msra.mxu0 %v711_v4  ;;  %v328_v4 = vld [vmem:[#allocation3] sm:$0xff] }
  0x5a   : > { %590 = vmatpush.msrb.mxu2 %v339_v1 }
  0x5b   : > { %717 = vmatpush.msra.mxu0 %v710_v5 }
  0x5c   : > { %591 = vmatpush.msrb.mxu2 %v335_v2 }
  0x5d   : > { %718 = vmatpush.msra.mxu0 %v709_v6 }
  0x5e   : > { %592 = vmatpush.msrb.mxu2 %v331_v3 }
  0x5f   : > { %593 = vmatmul.f32.vlgmr.msrb.gmra.mxu2 %v326_v63  ;;  %719 = vmatpush.msra.mxu0 %v708_v9 }
  0x61   : > { %720 = vmatpush.msra.mxu0 %v707_v10 }
  0x63   : > { %721 = vmatpush.msra.mxu0 %v706_v11 }
  0x65   : > { %722 = vmatpush.msra.mxu0 %v705_v13 }
  0x67   : > { %723 = vmatpush.msra.mxu0 %v704_v15 }
  0x69   : > { %724 = vmatpush.msra.mxu0 %v703_v20 }
  0x6b   : > { %725 = vmatpush.msra.mxu0 %v702_v23  ;;  %v838_v23 = vld [vmem:[%s1231_s7] ss:$0 sm:$0xff] }
  0x6d   : > { %726 = vmatpush.msra.mxu0 %v701_v26 }
  0x6f   : > { %727 = vmatpush.msra.mxu0 %v700_v31 }
  0x71   : > { %728 = vmatpush.msra.mxu0 %v699_v32 }
  0x73   : > { %729 = vmatpush.msra.mxu0 %v698_v35 }
  0x75   : > { %730 = vmatpush.msra.mxu0 %v697_v37 }
  0x77   : > { %731 = vmatpush.msra.mxu0 %v696_v39 }
  0xc7   : > { %v474_v7 = vpop.f32.mrf.mxu0 }
  0xc9   : > { %v494_v8 = vpop.f32.mrf.mxu1 }
  0xd2   : > { %v534_v14 = vpop.f32.mrf.mxu3 }
  0xd4   : > { %v554_v18 = vpop.f32.mrf.mxu0 }
  0xd5   : > { %v574_v19 = vpop.f32.mrf.mxu1  ;;  %v555_v21 = vadd.f32 %v554_v18, %v474_v7 }
  0xd6   : > { %v575_v22 = vadd.f32 %v574_v19, %v494_v8 }
  0xd7   : > { %v627_v24 = vadd.f32 %v619_v16, %v555_v21 }
  0xd8   : > { %v628_v25 = vadd.f32 %v620_v17, %v575_v22 }
  0xd9   : > { %v812_v27 = vmul.f32 -1.442695, %v627_v24  ;;  %v514_v29 = vpop.f32.mrf.mxu2 }
  0xda   : > { %v813_v28 = vmul.f32 -1.442695, %v628_v25 }
  0xdb   : > { %839 = vpow2.f32 %v812_v27 }
  0xdc   : > { %v614_v33 = vpop.f32.mrf.mxu3  ;;  %841 = vpow2.f32 %v813_v28 }
  0xdd   : > { %v615_v34 = vadd.f32 %v614_v33, %v534_v14 }
  0xdf   : > { %v630_v36 = vadd.f32 %v622_v30, %v615_v34 }
  0xe1   : > { %v814_v38 = vmul.f32 -1.442695, %v630_v36  ;;  %v840_v40 = vpop.eup %839 }
  0xe2   : > { %v842_v41 = vpop.eup %841  ;;  %v634_v42 = vadd.f32 1.0, %v840_v40  ;;  %v594_v44 = vpop.f32.mrf.mxu2 }
  0xe3   : > { %843 = vpow2.f32 %v814_v38  ;;  %v653_v43 = vadd.f32 1.0, %v842_v41  ;;  %v595_v45 = vadd.f32 %v594_v44, %v514_v29 }
  0xe4   : > { %845 = vrcp.f32 %v634_v42  ;;  %v646_v56 = vand.u32 2147483648, %v634_v42  ;;  %v644_v59 = vand.u32 2147483647, %v634_v42  ;;  %vm640_vm2 = vweird.f32 %v634_v42 }
  0xe5   : > { %847 = vrcp.f32 %v653_v43  ;;  %v629_v50 = vadd.f32 %v621_v46, %v595_v45  ;;  %v665_v57 = vand.u32 2147483648, %v653_v43  ;;  %v663_v61 = vand.u32 2147483647, %v653_v43 }
  0xe6   : > { %vm659_vm3 = vweird.f32 %v653_v43  ;;  %v647_v1 = vor.u32 1.1754944e-38, %v646_v56  ;;  %vm645_vm6 = vcmp.eq.f32.partialorder %v644_v59, 8.507059e+37 }
  0xe7   : > { %v666_v3 = vor.u32 1.1754944e-38, %v665_v57  ;;  %vm664_vm7 = vcmp.eq.f32.partialorder %v663_v61, 8.507059e+37 }
  0xe9   : > { %v844_v47 = vpop.eup %843 }
  0xea   : > { %v673_v48 = vadd.f32 1.0, %v844_v47  ;;  %v846_v49 = vpop.eup %845 }
  0xeb   : > { %v848_v51 = vpop.eup %847  ;;  %v636_v52 = vmul.f32 %v846_v49, %v634_v42  ;;  %vm641_vm0 = vweird.f32 %v846_v49 }
  0xec   : > { %849 = vrcp.f32 %v673_v48  ;;  %v655_v53 = vmul.f32 %v848_v51, %v653_v43  ;;  %vm660_vm1 = vweird.f32 %v848_v51  ;;  %vm642_vm4 = vmor %vm640_vm2, %vm641_vm0  ;;  %v685_v16 = vand.u32 2147483648, %v673_v48 }
  0xed   : > { %v637_v54 = vsub.f32 1.0, %v636_v52  ;;  %851 = vtanh.f32 %v629_v50  ;;  %vm661_vm5 = vmor %vm659_vm3, %vm660_vm1  ;;  %vm679_vm9 = vweird.f32 %v673_v48  ;;  %v683_v17 = vand.u32 2147483647, %v673_v48 }
  0xee   : > { %v656_v55 = vsub.f32 1.0, %v655_v53  ;;  %v686_v19 = vor.u32 1.1754944e-38, %v685_v16 }
  0xef   : > { %v638_v58 = vmul.f32 %v846_v49, %v637_v54  ;;  %vm684_vm11 = vcmp.eq.f32.partialorder %v683_v17, 8.507059e+37 }
  0xf0   : > { %v657_v60 = vmul.f32 %v848_v51, %v656_v55 }
  0xf1   : > { %v639_v63 = vadd.f32 %v846_v49, %v638_v58 }
  0xf2   : > { %v850_v62 = vpop.eup %849  ;;  %v658_v2 = vadd.f32 %v848_v51, %v657_v60 }
  0xf3   : > { %v675_v0 = vmul.f32 %v850_v62, %v673_v48  ;;  %v643_v5 = vsel %vm642_vm4, %v846_v49, %v639_v63  ;;  %v852_v6 = vpop.eup %851  ;;  %vm680_vm8 = vweird.f32 %v850_v62 }
  0xf4   : > { %v648_v8 = vsel %vm645_vm6, %v647_v1, %v643_v5  ;;  %v662_v9 = vsel %vm661_vm5, %v848_v51, %v658_v2  ;;  %vm681_vm10 = vmor %vm679_vm9, %vm680_vm8 }
  0xf5   : > { %v676_v7 = vsub.f32 1.0, %v675_v0  ;;  %v667_v10 = vsel %vm664_vm7, %v666_v3, %v662_v9  ;;  %v690_v11 = vmul.f32 %v852_v6, %v648_v8 }
  0xf6   : > { %v689_v12 = vmul.f32 %v667_v10, %v328_v4 }
  0xf7   : > { %v677_v13 = vmul.f32 %v850_v62, %v676_v7 }
  0xf8   : > { %v691_v14 = vadd.f32 %v690_v11, %v689_v12 }
  0xf9   : > { %v678_v15 = vadd.f32 %v850_v62, %v677_v13 }
  0xfa   : > { %853 = vtanh.f32 %v691_v14  ;;  %695 = vst [vmem:[#allocation3] sm:$0xff] %v691_v14 }
  0xfb   : > { %v682_v18 = vsel %vm681_vm10, %v850_v62, %v678_v15 }
  0xfc   : > { %v687_v21 = vsel %vm684_vm11, %v686_v19, %v682_v18 }
 0x100   : > { %v854_v20 = vpop.eup %853 }
 0x101   : > { %v693_v22 = vmul.f32 %v854_v20, %v687_v21 }
 0x103   : > { %694 = vst [vmem:[#allocation2] sm:$0xff] %v693_v22  ;;  %732 = vmatmul.f32.vlgmr.msra.gmra.mxu0 %v693_v22 }
 0x180   : > { %v733_v24 = vpop.f32.mrf.mxu0 }
 0x181   : > { %v734_v25 = vadd.f32 %v838_v23, %v733_v24 }
 0x183   : > { %736 = vst [vmem:[%s964_s21] sm:$0xff] %v734_v25 }
 0x184 PF: > { %s19_s27 = sadd.s32 1, %s895_s27  }
 0x185   : > { %p16_p8 = scmp.ge.s32.totalorder %s19_s27, 7  }
 0x187   :  { %18 = sbr.rel (!%p16_p8) target bundleno = 1 (0x1), region = 91 }
 0x18c   :  { %756 = vsyncpa [#allocation5], 1 }
 0x18d   :  { %758 = vsyncpa [#allocation5 + $0x1], 1 }

// kernel: seq2seq_forward.2
= control target key start
LH: loop header
LB: loop body
LE: loop exit
PB: predicated region body
PF: predicated region fallthrough
CT: control target
= control target key end

     0   :  { %11 = vsyncpa [#allocation3], 0  ;;  %s771_s18 = smov 0   ;;  %s1005_s0 = inlined_call_operand.vmem [shape: f32[7,8,128], index: 0, kind: input, shape index: {}]   ;;  %s1006_s1 = inlined_call_operand.vmem [shape: f32[128,512], index: 1, kind: input, shape index: {}]   ;;  %s1007_s2 = inlined_call_operand.hbm [shape: f32[128,512], index: 2, kind: input, shape index: {}]   ;;  %s1008_s3 = inlined_call_operand.vmem [shape: f32[1,512], index: 3, kind: input, shape index: {}]   ;;  %s1009_s4 = inlined_call_operand.vmem [shape: f32[8,128], index: 4, kind: output, shape index: {0}]   ;;  %s1010_s5 = inlined_call_operand.vmem [shape: f32[8,128], index: 5, kind: output, shape index: {1}]  }
   0x1 LB: > { %s167_s21 = sshll.u32 %s1007_s2, 4  ;;  %s644_s22 = sadd.s32 4294967295, %s735_s18   ;;  %s735_s18 = sphi %s771_s18, %s17_s18   ;;  %s168_s21 = int_to_ptr.hbm [resolvable:$true] %s167_s21 }
   0x2   : > { %p645_p0 = scmp.ge.s32.totalorder %s735_s18, 1  ;;  %p153_p1 = scmp.lt.s32.totalorder %s735_s18, 8 }
   0x3   : > { %p646_p2 = scmp.ne.s32.totalorder %s644_s22, 0  ;;  %p665_p3 = scmp.eq.s32.totalorder %s644_s22, 0 }
   0x4   : > { %p154_p4 = pnand %p645_p0, %p153_p1  ;;  %s737_s23 = smov [#allocation2]  }
   0x5   : > { %s169_s24 = sshll.u32 %s737_s23, 4  ;;  %s738_s25 = smov 512   ;;  %s170_s24 = int_to_ptr.vmem [resolvable:$true] %s169_s24 }
   0x6   : > { %p661_p5 = pneg %p154_p4  ;;  %s739_s26 = smov 32  }
   0x7   : > { %195 = sbr.rel (%p154_p4) target bundleno = 260 (0x104), region = 36 }
   0x8   : > { %p662_p6 = pnand %p665_p3, %p661_p5 }
   0xa   : > { %664 = dma.hbm_to_vmem [thread:$0]  (!%p662_p6), %s168_s21, 8192, %s170_s24, [#allocation3], %s738_s25, %s738_s25, %s739_s26  }
   0xc   : > { %730 = dma.done.wait (%p665_p3), [#allocation3], 8192  }
   0xd   : > { %732 = vsyncadd (%p665_p3), [#allocation3], 4294959104  ;;  %p218_p7 = scmp.lt.s32.totalorder %s644_s22, 6 }
   0xe   : > { %225 = sbr.rel (%p646_p2) target bundleno = 22 (0x16), region = 44 }
   0xf   : > { %s219_s27 = scalar_select %p218_p7, %s644_s22, 6 }
  0x11   : > { %s650_s28 = sshll.u32 %s219_s27, 3 }
  0x12   : > { %s785_s6 = scalar_lea.vmem %s1005_s0, %s650_s28 }
  0x13   : > { %v740_v0 = vmov 0.0  }
  0x14   : > { %226 = vst [vmem:[%s1009_s4] sm:$0xff] %v740_v0 }
  0x15   : > { %227 = vst [vmem:[%s1010_s5] sm:$0xff] %v740_v0 }
  0x16 PF: > { %v355_v1 = vld [vmem:[#allocation2 + $0x1e0] sm:$0xff]  ;;  %v356_v2 = vld [vmem:[#allocation2 + $0x1e8] sm:$0xff]  ;;  %v358_v3 = vld [vmem:[#allocation2 + $0x1f8] sm:$0xff] }
  0x17   : > { %359 = vmatpush.msra.mxu0 %v355_v1  ;;  %379 = vmatpush.msra.mxu1 %v356_v2  ;;  %v351_v4 = vld [vmem:[#allocation2 + $0x1c0] sm:$0xff]  ;;  %v352_v5 = vld [vmem:[#allocation2 + $0x1c8] sm:$0xff]  ;;  %v354_v6 = vld [vmem:[#allocation2 + $0x1d8] sm:$0xff] }
  0x18   : > { %419 = vmatpush.msra.mxu3 %v358_v3  ;;  %v347_v7 = vld [vmem:[#allocation2 + $0x1a0] sm:$0xff]  ;;  %v348_v8 = vld [vmem:[#allocation2 + $0x1a8] sm:$0xff]  ;;  %v350_v9 = vld [vmem:[#allocation2 + $0x1b8] sm:$0xff] }
  0x19   : > { %360 = vmatpush.msra.mxu0 %v351_v4  ;;  %380 = vmatpush.msra.mxu1 %v352_v5  ;;  %v343_v10 = vld [vmem:[#allocation2 + $0x180] sm:$0xff]  ;;  %v344_v11 = vld [vmem:[#allocation2 + $0x188] sm:$0xff]  ;;  %v357_v12 = vld [vmem:[#allocation2 + $0x1f0] sm:$0xff] }
  0x1a   : > { %420 = vmatpush.msra.mxu3 %v354_v6  ;;  %v346_v13 = vld [vmem:[#allocation2 + $0x198] sm:$0xff]  ;;  %v353_v14 = vld [vmem:[#allocation2 + $0x1d0] sm:$0xff]  ;;  %399 = vmatpush.msra.mxu2 %v357_v12  ;;  %v339_v15 = vld [vmem:[#allocation2 + $0x160] sm:$0xff] }
  0x1b   : > { %361 = vmatpush.msra.mxu0 %v347_v7  ;;  %381 = vmatpush.msra.mxu1 %v348_v8  ;;  %v340_v16 = vld [vmem:[#allocation2 + $0x168] sm:$0xff]  ;;  %v342_v17 = vld [vmem:[#allocation2 + $0x178] sm:$0xff]  ;;  %v349_v18 = vld [vmem:[#allocation2 + $0x1b0] sm:$0xff] }
  0x1c   : > { %421 = vmatpush.msra.mxu3 %v350_v9  ;;  %400 = vmatpush.msra.mxu2 %v353_v14  ;;  %v335_v19 = vld [vmem:[#allocation2 + $0x140] sm:$0xff]  ;;  %v336_v20 = vld [vmem:[#allocation2 + $0x148] sm:$0xff]  ;;  %v338_v21 = vld [vmem:[#allocation2 + $0x158] sm:$0xff] }
  0x1d   : > { %362 = vmatpush.msra.mxu0 %v343_v10  ;;  %382 = vmatpush.msra.mxu1 %v344_v11  ;;  %v345_v22 = vld [vmem:[#allocation2 + $0x190] sm:$0xff]  ;;  %v331_v23 = vld [vmem:[#allocation2 + $0x120] sm:$0xff]  ;;  %v332_v24 = vld [vmem:[#allocation2 + $0x128] sm:$0xff] }
  0x1e   : > { %422 = vmatpush.msra.mxu3 %v346_v13  ;;  %401 = vmatpush.msra.mxu2 %v349_v18  ;;  %v334_v25 = vld [vmem:[#allocation2 + $0x138] sm:$0xff]  ;;  %v341_v26 = vld [vmem:[#allocation2 + $0x170] sm:$0xff]  ;;  %v327_v27 = vld [vmem:[#allocation2 + $0x100] sm:$0xff] }
  0x1f   : > { %363 = vmatpush.msra.mxu0 %v339_v15  ;;  %383 = vmatpush.msra.mxu1 %v340_v16  ;;  %v328_v28 = vld [vmem:[#allocation2 + $0x108] sm:$0xff]  ;;  %v330_v29 = vld [vmem:[#allocation2 + $0x118] sm:$0xff]  ;;  %v337_v30 = vld [vmem:[#allocation2 + $0x150] sm:$0xff] }
  0x20   : > { %423 = vmatpush.msra.mxu3 %v342_v17  ;;  %402 = vmatpush.msra.mxu2 %v345_v22  ;;  %v323_v31 = vld [vmem:[#allocation2 + $0xe0] sm:$0xff]  ;;  %v324_v32 = vld [vmem:[#allocation2 + $0xe8] sm:$0xff]  ;;  %v326_v33 = vld [vmem:[#allocation2 + $0xf8] sm:$0xff] }
  0x21   : > { %364 = vmatpush.msra.mxu0 %v335_v19  ;;  %384 = vmatpush.msra.mxu1 %v336_v20  ;;  %v333_v34 = vld [vmem:[#allocation2 + $0x130] sm:$0xff]  ;;  %v319_v35 = vld [vmem:[#allocation2 + $0xc0] sm:$0xff]  ;;  %v320_v36 = vld [vmem:[#allocation2 + $0xc8] sm:$0xff] }
  0x22   : > { %424 = vmatpush.msra.mxu3 %v338_v21  ;;  %403 = vmatpush.msra.mxu2 %v341_v26  ;;  %v322_v37 = vld [vmem:[#allocation2 + $0xd8] sm:$0xff]  ;;  %v329_v38 = vld [vmem:[#allocation2 + $0x110] sm:$0xff]  ;;  %v315_v39 = vld [vmem:[#allocation2 + $0xa0] sm:$0xff] }
  0x23   : > { %365 = vmatpush.msra.mxu0 %v331_v23  ;;  %385 = vmatpush.msra.mxu1 %v332_v24  ;;  %v316_v40 = vld [vmem:[#allocation2 + $0xa8] sm:$0xff]  ;;  %v318_v41 = vld [vmem:[#allocation2 + $0xb8] sm:$0xff]  ;;  %v325_v42 = vld [vmem:[#allocation2 + $0xf0] sm:$0xff] }
  0x24   : > { %425 = vmatpush.msra.mxu3 %v334_v25  ;;  %404 = vmatpush.msra.mxu2 %v337_v30  ;;  %v311_v43 = vld [vmem:[#allocation2 + $0x80] sm:$0xff]  ;;  %v312_v44 = vld [vmem:[#allocation2 + $0x88] sm:$0xff]  ;;  %v314_v45 = vld [vmem:[#allocation2 + $0x98] sm:$0xff] }
  0x25   : > { %366 = vmatpush.msra.mxu0 %v327_v27  ;;  %386 = vmatpush.msra.mxu1 %v328_v28  ;;  %v321_v46 = vld [vmem:[#allocation2 + $0xd0] sm:$0xff]  ;;  %v307_v47 = vld [vmem:[#allocation2 + $0x60] sm:$0xff]  ;;  %v308_v48 = vld [vmem:[#allocation2 + $0x68] sm:$0xff] }
  0x26   : > { %426 = vmatpush.msra.mxu3 %v330_v29  ;;  %405 = vmatpush.msra.mxu2 %v333_v34  ;;  %v310_v49 = vld [vmem:[#allocation2 + $0x78] sm:$0xff]  ;;  %v317_v50 = vld [vmem:[#allocation2 + $0xb0] sm:$0xff]  ;;  %v303_v51 = vld [vmem:[#allocation2 + $0x40] sm:$0xff] }
  0x27   : > { %367 = vmatpush.msra.mxu0 %v323_v31  ;;  %387 = vmatpush.msra.mxu1 %v324_v32  ;;  %v304_v52 = vld [vmem:[#allocation2 + $0x48] sm:$0xff]  ;;  %v306_v53 = vld [vmem:[#allocation2 + $0x58] sm:$0xff]  ;;  %v313_v54 = vld [vmem:[#allocation2 + $0x90] sm:$0xff] }
  0x28   : > { %427 = vmatpush.msra.mxu3 %v326_v33  ;;  %406 = vmatpush.msra.mxu2 %v329_v38  ;;  %v299_v55 = vld [vmem:[#allocation2 + $0x20] sm:$0xff]  ;;  %v300_v56 = vld [vmem:[#allocation2 + $0x28] sm:$0xff]  ;;  %v302_v57 = vld [vmem:[#allocation2 + $0x38] sm:$0xff] }
  0x29   : > { %368 = vmatpush.msra.mxu0 %v319_v35  ;;  %388 = vmatpush.msra.mxu1 %v320_v36  ;;  %v309_v58 = vld [vmem:[#allocation2 + $0x70] sm:$0xff]  ;;  %v295_v59 = vld [vmem:[#allocation2] sm:$0xff]  ;;  %v296_v60 = vld [vmem:[#allocation2 + $0x8] sm:$0xff] }
  0x2a   : > { %428 = vmatpush.msra.mxu3 %v322_v37  ;;  %407 = vmatpush.msra.mxu2 %v325_v42  ;;  %v298_v61 = vld [vmem:[#allocation2 + $0x18] sm:$0xff]  ;;  %v291_v62 = vld [vmem:[%s1006_s1 + $0x1e0] sm:$0xff]  ;;  %v292_v63 = vld [vmem:[%s1006_s1 + $0x1e8] sm:$0xff] }
  0x2b   : > { %369 = vmatpush.msra.mxu0 %v315_v39  ;;  %389 = vmatpush.msra.mxu1 %v316_v40  ;;  %v294_v0 = vld [vmem:[%s1006_s1 + $0x1f8] sm:$0xff]  ;;  %v305_v1 = vld [vmem:[#allocation2 + $0x50] sm:$0xff]  ;;  %v287_v2 = vld [vmem:[%s1006_s1 + $0x1c0] sm:$0xff] }
  0x2c   : > { %429 = vmatpush.msra.mxu3 %v318_v41  ;;  %408 = vmatpush.msra.mxu2 %v321_v46  ;;  %v288_v3 = vld [vmem:[%s1006_s1 + $0x1c8] sm:$0xff]  ;;  %v290_v4 = vld [vmem:[%s1006_s1 + $0x1d8] sm:$0xff]  ;;  %v301_v5 = vld [vmem:[#allocation2 + $0x30] sm:$0xff] }
  0x2d   : > { %370 = vmatpush.msra.mxu0 %v311_v43  ;;  %390 = vmatpush.msra.mxu1 %v312_v44  ;;  %v283_v6 = vld [vmem:[%s1006_s1 + $0x1a0] sm:$0xff]  ;;  %v284_v7 = vld [vmem:[%s1006_s1 + $0x1a8] sm:$0xff]  ;;  %v286_v8 = vld [vmem:[%s1006_s1 + $0x1b8] sm:$0xff] }
  0x2e   : > { %430 = vmatpush.msra.mxu3 %v314_v45  ;;  %409 = vmatpush.msra.mxu2 %v317_v50  ;;  %v297_v9 = vld [vmem:[#allocation2 + $0x10] sm:$0xff]  ;;  %v279_v10 = vld [vmem:[%s1006_s1 + $0x180] sm:$0xff]  ;;  %v280_v11 = vld [vmem:[%s1006_s1 + $0x188] sm:$0xff] }
  0x2f   : > { %371 = vmatpush.msra.mxu0 %v307_v47  ;;  %391 = vmatpush.msra.mxu1 %v308_v48  ;;  %v282_v12 = vld [vmem:[%s1006_s1 + $0x198] sm:$0xff]  ;;  %v293_v13 = vld [vmem:[%s1006_s1 + $0x1f0] sm:$0xff]  ;;  %v275_v14 = vld [vmem:[%s1006_s1 + $0x160] sm:$0xff] }
  0x30   : > { %431 = vmatpush.msra.mxu3 %v310_v49  ;;  %410 = vmatpush.msra.mxu2 %v313_v54  ;;  %v276_v15 = vld [vmem:[%s1006_s1 + $0x168] sm:$0xff]  ;;  %v278_v16 = vld [vmem:[%s1006_s1 + $0x178] sm:$0xff]  ;;  %v289_v17 = vld [vmem:[%s1006_s1 + $0x1d0] sm:$0xff] }
  0x31   : > { %372 = vmatpush.msra.mxu0 %v303_v51  ;;  %392 = vmatpush.msra.mxu1 %v304_v52  ;;  %v271_v18 = vld [vmem:[%s1006_s1 + $0x140] sm:$0xff]  ;;  %v272_v19 = vld [vmem:[%s1006_s1 + $0x148] sm:$0xff]  ;;  %v274_v20 = vld [vmem:[%s1006_s1 + $0x158] sm:$0xff] }
  0x32   : > { %432 = vmatpush.msra.mxu3 %v306_v53  ;;  %411 = vmatpush.msra.mxu2 %v309_v58  ;;  %v285_v21 = vld [vmem:[%s1006_s1 + $0x1b0] sm:$0xff]  ;;  %v267_v22 = vld [vmem:[%s1006_s1 + $0x120] sm:$0xff]  ;;  %v268_v23 = vld [vmem:[%s1006_s1 + $0x128] sm:$0xff] }
  0x33   : > { %373 = vmatpush.msra.mxu0 %v299_v55  ;;  %393 = vmatpush.msra.mxu1 %v300_v56  ;;  %v270_v24 = vld [vmem:[%s1006_s1 + $0x138] sm:$0xff]  ;;  %v281_v25 = vld [vmem:[%s1006_s1 + $0x190] sm:$0xff]  ;;  %v263_v26 = vld [vmem:[%s1006_s1 + $0x100] sm:$0xff] }
  0x34   : > { %433 = vmatpush.msra.mxu3 %v302_v57  ;;  %412 = vmatpush.msra.mxu2 %v305_v1  ;;  %v264_v27 = vld [vmem:[%s1006_s1 + $0x108] sm:$0xff]  ;;  %v266_v28 = vld [vmem:[%s1006_s1 + $0x118] sm:$0xff]  ;;  %v277_v29 = vld [vmem:[%s1006_s1 + $0x170] sm:$0xff] }
  0x35   : > { %374 = vmatpush.msra.mxu0 %v295_v59  ;;  %394 = vmatpush.msra.mxu1 %v296_v60  ;;  %v259_v30 = vld [vmem:[%s1006_s1 + $0xe0] sm:$0xff]  ;;  %v260_v31 = vld [vmem:[%s1006_s1 + $0xe8] sm:$0xff]  ;;  %v262_v32 = vld [vmem:[%s1006_s1 + $0xf8] sm:$0xff] }
  0x36   : > { %434 = vmatpush.msra.mxu3 %v298_v61  ;;  %413 = vmatpush.msra.mxu2 %v301_v5  ;;  %v273_v33 = vld [vmem:[%s1006_s1 + $0x150] sm:$0xff]  ;;  %v255_v34 = vld [vmem:[%s1006_s1 + $0xc0] sm:$0xff]  ;;  %v256_v35 = vld [vmem:[%s1006_s1 + $0xc8] sm:$0xff] }
  0x37   : > { %439 = vmatpush.msrb.mxu0 %v291_v62  ;;  %459 = vmatpush.msrb.mxu1 %v292_v63  ;;  %v258_v36 = vld [vmem:[%s1006_s1 + $0xd8] sm:$0xff]  ;;  %v269_v37 = vld [vmem:[%s1006_s1 + $0x130] sm:$0xff]  ;;  %v251_v38 = vld [vmem:[%s1006_s1 + $0xa0] sm:$0xff] }
  0x38   : > { %499 = vmatpush.msrb.mxu3 %v294_v0  ;;  %414 = vmatpush.msra.mxu2 %v297_v9  ;;  %v252_v39 = vld [vmem:[%s1006_s1 + $0xa8] sm:$0xff]  ;;  %v254_v40 = vld [vmem:[%s1006_s1 + $0xb8] sm:$0xff]  ;;  %v265_v41 = vld [vmem:[%s1006_s1 + $0x110] sm:$0xff] }
  0x39   : > { %440 = vmatpush.msrb.mxu0 %v287_v2  ;;  %460 = vmatpush.msrb.mxu1 %v288_v3  ;;  %v247_v42 = vld [vmem:[%s1006_s1 + $0x80] sm:$0xff]  ;;  %v248_v43 = vld [vmem:[%s1006_s1 + $0x88] sm:$0xff]  ;;  %v250_v44 = vld [vmem:[%s1006_s1 + $0x98] sm:$0xff] }
  0x3a   : > { %500 = vmatpush.msrb.mxu3 %v290_v4  ;;  %479 = vmatpush.msrb.mxu2 %v293_v13  ;;  %v229_v45 = vld [vmem:[%s1009_s4] sm:$0xff]  ;;  %v261_v46 = vld [vmem:[%s1006_s1 + $0xf0] sm:$0xff]  ;;  %v244_v48 = vld [vmem:[%s1006_s1 + $0x68] sm:$0xff] }
  0x3b   : > { %441 = vmatpush.msrb.mxu0 %v283_v6  ;;  %461 = vmatpush.msrb.mxu1 %v284_v7  ;;  %v243_v47 = vld [vmem:[%s1006_s1 + $0x60] sm:$0xff]  ;;  %v246_v49 = vld [vmem:[%s1006_s1 + $0x78] sm:$0xff]  ;;  %v257_v50 = vld [vmem:[%s1006_s1 + $0xd0] sm:$0xff] }
  0x3c   : > { %501 = vmatpush.msrb.mxu3 %v286_v8  ;;  %480 = vmatpush.msrb.mxu2 %v289_v17  ;;  %v239_v51 = vld [vmem:[%s1006_s1 + $0x40] sm:$0xff]  ;;  %v240_v52 = vld [vmem:[%s1006_s1 + $0x48] sm:$0xff]  ;;  %v242_v53 = vld [vmem:[%s1006_s1 + $0x58] sm:$0xff] }
  0x3d   : > { %442 = vmatpush.msrb.mxu0 %v279_v10  ;;  %462 = vmatpush.msrb.mxu1 %v280_v11  ;;  %v253_v54 = vld [vmem:[%s1006_s1 + $0xb0] sm:$0xff]  ;;  %v235_v55 = vld [vmem:[%s1006_s1 + $0x20] sm:$0xff]  ;;  %v236_v56 = vld [vmem:[%s1006_s1 + $0x28] sm:$0xff] }
  0x3e   : > { %502 = vmatpush.msrb.mxu3 %v282_v12  ;;  %481 = vmatpush.msrb.mxu2 %v285_v21  ;;  %v238_v57 = vld [vmem:[%s1006_s1 + $0x38] sm:$0xff]  ;;  %v249_v58 = vld [vmem:[%s1006_s1 + $0x90] sm:$0xff]  ;;  %v231_v59 = vld [vmem:[%s1006_s1] sm:$0xff] }
  0x3f   : > { %443 = vmatpush.msrb.mxu0 %v275_v14  ;;  %463 = vmatpush.msrb.mxu1 %v276_v15  ;;  %v232_v60 = vld [vmem:[%s1006_s1 + $0x8] sm:$0xff]  ;;  %v234_v61 = vld [vmem:[%s1006_s1 + $0x18] sm:$0xff]  ;;  %v228_v62 = vld [vmem:[%s785_s6] sm:$0xff] }
  0x40   : > { %503 = vmatpush.msrb.mxu3 %v278_v16  ;;  %482 = vmatpush.msrb.mxu2 %v281_v25  ;;  %v245_v63 = vld [vmem:[%s1006_s1 + $0x70] sm:$0xff]  ;;  %v519_v5 = vld [vmem:[%s1008_s3] sm:$0xf] }
  0x41   : > { %444 = vmatpush.msrb.mxu0 %v271_v18  ;;  %464 = vmatpush.msrb.mxu1 %v272_v19  ;;  %v241_v0 = vld [vmem:[%s1006_s1 + $0x50] sm:$0xff]  ;;  %v521_v7 = vperm.slane %v519_v5, 0  ;;  %v522_v8 = vperm.slane %v519_v5, 1  ;;  %v524_v18 = vperm.slane %v519_v5, 3 }
  0x42   : > { %504 = vmatpush.msrb.mxu3 %v274_v20  ;;  %483 = vmatpush.msrb.mxu2 %v277_v29  ;;  %v237_v1 = vld [vmem:[%s1006_s1 + $0x30] sm:$0xff]  ;;  %v523_v29 = vperm.slane %v519_v5, 2 }
  0x43   : > { %445 = vmatpush.msrb.mxu0 %v267_v22  ;;  %465 = vmatpush.msrb.mxu1 %v268_v23  ;;  %v233_v2 = vld [vmem:[%s1006_s1 + $0x10] sm:$0xff] }
  0x44   : > { %505 = vmatpush.msrb.mxu3 %v270_v24  ;;  %484 = vmatpush.msrb.mxu2 %v273_v33 }
  0x45   : > { %446 = vmatpush.msrb.mxu0 %v263_v26  ;;  %466 = vmatpush.msrb.mxu1 %v264_v27 }
  0x46   : > { %506 = vmatpush.msrb.mxu3 %v266_v28  ;;  %485 = vmatpush.msrb.mxu2 %v269_v37 }
  0x47   : > { %447 = vmatpush.msrb.mxu0 %v259_v30  ;;  %467 = vmatpush.msrb.mxu1 %v260_v31 }
  0x48   : > { %507 = vmatpush.msrb.mxu3 %v262_v32  ;;  %486 = vmatpush.msrb.mxu2 %v265_v41 }
  0x49   : > { %448 = vmatpush.msrb.mxu0 %v255_v34  ;;  %468 = vmatpush.msrb.mxu1 %v256_v35 }
  0x4a   : > { %508 = vmatpush.msrb.mxu3 %v258_v36  ;;  %375 = vmatmul.f32.vlgmr.msra.gmra.mxu0 %v229_v45 }
  0x4b   : > { %449 = vmatpush.msrb.mxu0 %v251_v38  ;;  %469 = vmatpush.msrb.mxu1 %v252_v39 }
  0x4c   : > { %509 = vmatpush.msrb.mxu3 %v254_v40  ;;  %395 = vmatmul.f32.vlgmr.msra.gmra.mxu1 %v229_v45 }
  0x4d   : > { %450 = vmatpush.msrb.mxu0 %v247_v42  ;;  %470 = vmatpush.msrb.mxu1 %v248_v43 }
  0x4e   : > { %510 = vmatpush.msrb.mxu3 %v250_v44  ;;  %487 = vmatpush.msrb.mxu2 %v261_v46 }
  0x4f   : > { %435 = vmatmul.f32.vlgmr.msra.gmra.mxu3 %v229_v45  ;;  %451 = vmatpush.msrb.mxu0 %v243_v47 }
  0x50   : > { %471 = vmatpush.msrb.mxu1 %v244_v48  ;;  %511 = vmatpush.msrb.mxu3 %v246_v49 }
  0x51   : > { %488 = vmatpush.msrb.mxu2 %v257_v50  ;;  %452 = vmatpush.msrb.mxu0 %v239_v51  ;;  %v230_v51 = vld [vmem:[%s1010_s5] sm:$0xff] }
  0x52   : > { %472 = vmatpush.msrb.mxu1 %v240_v52  ;;  %512 = vmatpush.msrb.mxu3 %v242_v53 }
  0x53   : > { %489 = vmatpush.msrb.mxu2 %v253_v54  ;;  %453 = vmatpush.msrb.mxu0 %v235_v55 }
  0x54   : > { %473 = vmatpush.msrb.mxu1 %v236_v56  ;;  %513 = vmatpush.msrb.mxu3 %v238_v57 }
  0x55   : > { %490 = vmatpush.msrb.mxu2 %v249_v58  ;;  %454 = vmatpush.msrb.mxu0 %v231_v59 }
  0x56   : > { %415 = vmatmul.f32.vlgmr.msra.gmra.mxu2 %v229_v45  ;;  %474 = vmatpush.msrb.mxu1 %v232_v60 }
  0x57   : > { %514 = vmatpush.msrb.mxu3 %v234_v61  ;;  %455 = vmatmul.f32.vlgmr.msrb.gmra.mxu0 %v228_v62 }
  0x58   : > { %475 = vmatmul.f32.vlgmr.msrb.gmra.mxu1 %v228_v62  ;;  %491 = vmatpush.msrb.mxu2 %v245_v63 }
  0x59   : > { %515 = vmatmul.f32.vlgmr.msrb.gmra.mxu3 %v228_v62 }
  0x5a   : > { %492 = vmatpush.msrb.mxu2 %v241_v0 }
  0x5c   : > { %493 = vmatpush.msrb.mxu2 %v237_v1 }
  0x5e   : > { %494 = vmatpush.msrb.mxu2 %v233_v2 }
  0x5f   : > { %495 = vmatmul.f32.vlgmr.msrb.gmra.mxu2 %v228_v62 }
  0xc7   : > { %v376_v3 = vpop.f32.mrf.mxu0 }
  0xc9   : > { %v396_v4 = vpop.f32.mrf.mxu1 }
  0xd2   : > { %v436_v6 = vpop.f32.mrf.mxu3 }
  0xd4   : > { %v456_v9 = vpop.f32.mrf.mxu0 }
  0xd5   : > { %v476_v10 = vpop.f32.mrf.mxu1  ;;  %v457_v11 = vadd.f32 %v456_v9, %v376_v3 }
  0xd6   : > { %v477_v12 = vadd.f32 %v476_v10, %v396_v4 }
  0xd7   : > { %v529_v13 = vadd.f32 %v521_v7, %v457_v11 }
  0xd8   : > { %v530_v14 = vadd.f32 %v522_v8, %v477_v12 }
  0xd9   : > { %v652_v15 = vmul.f32 -1.442695, %v529_v13  ;;  %v416_v17 = vpop.f32.mrf.mxu2 }
  0xda   : > { %v653_v16 = vmul.f32 -1.442695, %v530_v14 }
  0xdb   : > { %679 = vpow2.f32 %v652_v15 }
  0xdc   : > { %v516_v19 = vpop.f32.mrf.mxu3  ;;  %681 = vpow2.f32 %v653_v16 }
  0xdd   : > { %v517_v20 = vadd.f32 %v516_v19, %v436_v6 }
  0xdf   : > { %v532_v21 = vadd.f32 %v524_v18, %v517_v20 }
  0xe1   : > { %v654_v22 = vmul.f32 -1.442695, %v532_v21  ;;  %v680_v23 = vpop.eup %679 }
  0xe2   : > { %v682_v24 = vpop.eup %681  ;;  %v536_v25 = vadd.f32 1.0, %v680_v23  ;;  %v496_v27 = vpop.f32.mrf.mxu2 }
  0xe3   : > { %683 = vpow2.f32 %v654_v22  ;;  %v555_v26 = vadd.f32 1.0, %v682_v24  ;;  %v497_v28 = vadd.f32 %v496_v27, %v416_v17 }
  0xe4   : > { %685 = vrcp.f32 %v536_v25  ;;  %v548_v39 = vand.u32 2147483648, %v536_v25  ;;  %v546_v42 = vand.u32 2147483647, %v536_v25  ;;  %vm542_vm2 = vweird.f32 %v536_v25 }
  0xe5   : > { %687 = vrcp.f32 %v555_v26  ;;  %v531_v33 = vadd.f32 %v523_v29, %v497_v28  ;;  %v567_v40 = vand.u32 2147483648, %v555_v26  ;;  %v565_v44 = vand.u32 2147483647, %v555_v26 }
  0xe6   : > { %vm561_vm3 = vweird.f32 %v555_v26  ;;  %v549_v48 = vor.u32 1.1754944e-38, %v548_v39  ;;  %vm547_vm6 = vcmp.eq.f32.partialorder %v546_v42, 8.507059e+37 }
  0xe7   : > { %v568_v50 = vor.u32 1.1754944e-38, %v567_v40  ;;  %vm566_vm7 = vcmp.eq.f32.partialorder %v565_v44, 8.507059e+37 }
  0xe9   : > { %v684_v30 = vpop.eup %683 }
  0xea   : > { %v575_v31 = vadd.f32 1.0, %v684_v30  ;;  %v686_v32 = vpop.eup %685 }
  0xeb   : > { %v688_v34 = vpop.eup %687  ;;  %v538_v35 = vmul.f32 %v686_v32, %v536_v25  ;;  %vm543_vm0 = vweird.f32 %v686_v32 }
  0xec   : > { %689 = vrcp.f32 %v575_v31  ;;  %v557_v36 = vmul.f32 %v688_v34, %v555_v26  ;;  %vm562_vm1 = vweird.f32 %v688_v34  ;;  %vm544_vm4 = vmor %vm542_vm2, %vm543_vm0  ;;  %v587_v63 = vand.u32 2147483648, %v575_v31 }
  0xed   : > { %v539_v37 = vsub.f32 1.0, %v538_v35  ;;  %691 = vtanh.f32 %v531_v33  ;;  %vm563_vm5 = vmor %vm561_vm3, %vm562_vm1  ;;  %vm581_vm9 = vweird.f32 %v575_v31  ;;  %v585_v0 = vand.u32 2147483647, %v575_v31 }
  0xee   : > { %v558_v38 = vsub.f32 1.0, %v557_v36  ;;  %v588_v2 = vor.u32 1.1754944e-38, %v587_v63 }
  0xef   : > { %v540_v41 = vmul.f32 %v686_v32, %v539_v37  ;;  %vm586_vm11 = vcmp.eq.f32.partialorder %v585_v0, 8.507059e+37 }
  0xf0   : > { %v559_v43 = vmul.f32 %v688_v34, %v558_v38 }
  0xf1   : > { %v541_v46 = vadd.f32 %v686_v32, %v540_v41 }
  0xf2   : > { %v690_v45 = vpop.eup %689  ;;  %v560_v49 = vadd.f32 %v688_v34, %v559_v43 }
  0xf3   : > { %v577_v47 = vmul.f32 %v690_v45, %v575_v31  ;;  %v545_v52 = vsel %vm544_vm4, %v686_v32, %v541_v46  ;;  %v692_v53 = vpop.eup %691  ;;  %vm582_vm8 = vweird.f32 %v690_v45 }
  0xf4   : > { %v550_v55 = vsel %vm547_vm6, %v549_v48, %v545_v52  ;;  %v564_v56 = vsel %vm563_vm5, %v688_v34, %v560_v49  ;;  %vm583_vm10 = vmor %vm581_vm9, %vm582_vm8 }
  0xf5   : > { %v578_v54 = vsub.f32 1.0, %v577_v47  ;;  %v569_v57 = vsel %vm566_vm7, %v568_v50, %v564_v56  ;;  %v592_v58 = vmul.f32 %v692_v53, %v550_v55 }
  0xf6   : > { %v591_v60 = vmul.f32 %v569_v57, %v230_v51 }
  0xf7   : > { %v579_v59 = vmul.f32 %v690_v45, %v578_v54 }
  0xf8   : > { %v593_v61 = vadd.f32 %v592_v58, %v591_v60 }
  0xf9   : > { %v580_v62 = vadd.f32 %v690_v45, %v579_v59 }
  0xfa   : > { %693 = vtanh.f32 %v593_v61  ;;  %597 = vst [vmem:[%s1010_s5] sm:$0xff] %v593_v61 }
  0xfb   : > { %v584_v1 = vsel %vm583_vm10, %v690_v45, %v580_v62 }
  0xfc   : > { %v589_v4 = vsel %vm586_vm11, %v588_v2, %v584_v1 }
 0x100   : > { %v694_v3 = vpop.eup %693 }
 0x101   : > { %v595_v5 = vmul.f32 %v694_v3, %v589_v4 }
 0x103   : > { %596 = vst [vmem:[%s1009_s4] sm:$0xff] %v595_v5 }
 0x104 PF: > { %s17_s18 = sadd.s32 1, %s735_s18  }
 0x105   : > { %p14_p8 = scmp.ge.s32.totalorder %s17_s18, 9  }
 0x107   :  { %16 = sbr.rel (!%p14_p8) target bundleno = 1 (0x1), region = 79 }
 0x10c   :  { %615 = vsyncpa [#allocation3], 1 }
 0x10d   :  { %617 = vsyncpa [#allocation3 + $0x1], 1 }

</bundles_post_ra>
